<compile_context>
chip_gen: v6e
topology: v6e:2x2x1
jax: 0.10.0
libtpu: 0.0.40
codegen_flags: <defaults>
</compile_context>

<pallas_src>
import math

import jax
import jax.numpy as jnp
import numpy as np
from jax.experimental import pallas as pl
from jax.experimental.pallas import tpu as pltpu


# ----------------------------- shared math -----------------------------------
def _layer_norm(x, gamma, beta, eps=1e-5):
    mu = jnp.mean(x, axis=-1, keepdims=True)
    var = jnp.mean((x - mu) ** 2, axis=-1, keepdims=True)
    return (x - mu) * jax.lax.rsqrt(var + eps) * gamma + beta


# ----------------------------- Pallas kernel ----------------------------------
def _encoder_last_token_kernel(
        x_ref, xl_ref,
        wq_ref, bq_ref, wkt_ref, seg_ref, wvo_ref, bvo_ref,
        g1_ref, be1_ref, w1_ref, bf1_ref, w2_ref, bf2_ref, g2_ref, be2_ref,
        proj_ref,
        out_ref):
    f32 = jnp.float32
    bf16 = jnp.bfloat16

    x = x_ref[...]                         # (bt, L, D) bf16  (streamed tile)
    x_last = xl_ref[...]                   # (bt, D)    f32   (exact residual path)
    bt, L, D = x.shape
    H = seg_ref.shape[0]

    # --- Q projection, last token only (mask=None path) -----------------------
    q = jnp.dot(x_last.astype(bf16), wq_ref[...],
                preferred_element_type=f32) + bq_ref[...]             # (bt, D)

    # --- fold q into Wk per head: wqk[b,h,e] = sum_{d in h} q[b,d] Wk[e,d]/sqrt(Dh)
    qseg = q[:, None, :] * seg_ref[...][None, :, :]                   # (bt, H, D)
    wqk = jnp.dot(qseg.reshape(bt * H, D).astype(bf16), wkt_ref[...],
                  preferred_element_type=f32).reshape(bt, H, D)

    # --- scores + softmax over tokens.  (bk contribution is constant over l
    #     and cancels in the softmax, so it is dropped.) ------------------------
    s = jnp.einsum("bhe,ble->bhl", wqk.astype(bf16), x,
                   preferred_element_type=f32)                        # (bt, H, L)
    s = s - jnp.max(s, axis=-1, keepdims=True)
    p = jnp.exp(s)
    p = p * pl.reciprocal(jnp.sum(p, axis=-1, keepdims=True), approx=True)

    # --- head-weighted token averages: xbar[b,h,e] = sum_l p[b,h,l] x[b,l,e] ---
    xbar = jnp.einsum("bhl,ble->bhe", p.astype(bf16), x,
                      preferred_element_type=f32)                     # (bt, H, D)

    # --- fused (Wv head-block @ Wo head-block) per head; bvo = bv@Wo + bo ------
    attn = jnp.zeros((bt, D), f32)
    for h in range(H):                                                # static unroll
        attn = attn + jnp.dot(xbar[:, h, :].astype(bf16), wvo_ref[h],
                              preferred_element_type=f32)
    attn = attn + bvo_ref[...]

    # --- residual + LN1, FFN + residual + LN2 (only B rows) --------------------
    h1 = _layer_norm(x_last + attn, g1_ref[...], be1_ref[...])
    ffn = jnp.dot(h1.astype(bf16), w1_ref[...],
                  preferred_element_type=f32) + bf1_ref[...]
    ffn = jnp.maximum(ffn, 0.0)
    ffn = jnp.dot(ffn.astype(bf16), w2_ref[...],
                  preferred_element_type=f32) + bf2_ref[...]
    h2 = _layer_norm(h1 + ffn, g2_ref[...], be2_ref[...])             # (bt, D)

    # --- image projection (lane-dense, padded to mult. of 128) + L2 normalize --
    emb = jnp.dot(h2.astype(bf16), proj_ref[...],
                  preferred_element_type=f32)                         # (bt, E_pad)
    inv = jax.lax.rsqrt(jnp.sum(emb * emb, axis=-1, keepdims=True) + 1e-12)
    out_ref[...] = emb * inv


# ------------------------------ wrapper ----------------------------------------
def _round_up(x, m):
    return ((x + m - 1) // m) * m


def _plan_tiles(B, L, D, H, ff, E_pad):
    """VMEM-budget-aware batch tile + vmem limit (safe on v7x's 64 MiB/TC)."""
    # Per-batch-row bytes: double-buffered streamed tiles (x bf16, x_last f32,
    # out f32) + rough live f32 temporaries inside the kernel.
    per_row = (2 * (L * D * 2 + D * 4 + E_pad * 4)
               + 4 * (3 * H * D + 2 * H * L + ff + E_pad + 8 * D))
    budget = 24 * 1024 * 1024
    bt = int(budget // max(per_row, 1))
    bt = max(8, min(bt, 1024))
    if B > 8:                            # >= 2 parallel grid steps for v7x's 2 TCs
        bt = min(bt, _round_up((B + 1) // 2, 8))
    bt = min(bt, _round_up(B, 8))        # never tile beyond the (padded) batch
    bt = max(8, (bt // 8) * 8)

    # Resident weights (bf16, double-buffered by default) + biases/LN (f32).
    weight_bytes = (2 * (2 * D * D + H * D * D + 2 * D * ff + D * E_pad)
                    + 4 * (10 * D + 2 * ff + H * D))
    vmem_est = 2 * weight_bytes + per_row * bt + (2 << 20)
    vmem_limit = int(min(48 * 1024 * 1024, max(32 * 1024 * 1024, vmem_est)))
    return bt, vmem_limit


def text_encoder_retrieval_forward(tokens, params, n_heads):
    """tokens: (B, L) int32.  Returns (B, embedding_image) float32, L2-normalized."""
    B, L = tokens.shape
    D = params["tok_emb"].shape[1]
    E = params["proj"].shape[1]
    H = n_heads
    Dh = D // H
    E_pad = _round_up(E, 128)

    lp = params["layers"][-1]            # only the last layer matters (header note)
    ff = lp["w1"].shape[1]

    # Embedding lookup (gather) kept in plain JAX glue.
    x = (params["tok_emb"][tokens] + params["pos_emb"][None, :L, :]).astype(jnp.float32)

    # ---- host-side weight prep -------------------------------------------------
    scale = 1.0 / math.sqrt(Dh)
    head_of = jnp.arange(D, dtype=jnp.int32) // Dh
    seg_t = (head_of[None, :] == jnp.arange(H, dtype=jnp.int32)[:, None])
    seg_t = seg_t.astype(jnp.float32) * scale                        # (H, D) scaled one-hot
    wkT = lp["wk"].T                                                  # (D, D): Wk[e,d] -> [d,e]
    wv_r = lp["wv"].reshape(D, H, Dh)
    wo_r = lp["wo"].reshape(H, Dh, D)
    wvo = jnp.einsum("ehk,hkj->hej", wv_r, wo_r)                      # (H, D, D)
    bvo = lp["bv"] @ lp["wo"] + lp["bo"]                              # (1, D)
    proj_pad = jnp.zeros((D, E_pad), jnp.float32).at[:, :E].set(params["proj"])

    bf = lambda a: a.astype(jnp.bfloat16)

    # ---- tile plan, batch padding ----------------------------------------------
    bt, vmem_limit = _plan_tiles(B, L, D, H, ff, E_pad)
    B_pad = _round_up(B, bt)
    x_bf = bf(x)                                                      # streamed in bf16
    x_last = x[:, L - 1, :]                                           # (B, D) f32
    if B_pad != B:
        x_bf = jnp.pad(x_bf, ((0, B_pad - B), (0, 0), (0, 0)))
        x_last = jnp.pad(x_last, ((0, B_pad - B), (0, 0)))

    args = (x_bf, x_last,
            bf(lp["wq"]), lp["bq"], bf(wkT), seg_t, bf(wvo), bvo,
            lp["ln1_g"], lp["ln1_b"], bf(lp["w1"]), lp["b1"],
            bf(lp["w2"]), lp["b2"], lp["ln2_g"], lp["ln2_b"],
            bf(proj_pad))

    def _resident_spec(a):
        zeros = (0,) * a.ndim
        return pl.BlockSpec(a.shape, lambda i: zeros)

    in_specs = ([pl.BlockSpec((bt, L, D), lambda i: (i, 0, 0)),
                 pl.BlockSpec((bt, D), lambda i: (i, 0))]
                + [_resident_spec(a) for a in args[2:]])
    out_specs = pl.BlockSpec((bt, E_pad), lambda i: (i, 0))

    out_pad = pl.pallas_call(
        _encoder_last_token_kernel,
        out_shape=jax.ShapeDtypeStruct((B_pad, E_pad), jnp.float32),
        grid=(B_pad // bt,),
        in_specs=in_specs,
        out_specs=out_specs,
        compiler_params=pltpu.CompilerParams(
            dimension_semantics=("parallel",),
            vmem_limit_bytes=vmem_limit),
    )(*args)
    return out_pad[:B, :E]


# --------------------------- param init / reference -----------------------------
def init_params(key, vocab_size, d_model, max_seq_len, n_layers, ff_dim, embedding_image):
    keys = jax.random.split(key, 4 + n_layers)
    scale = 0.02

    def dense(k, shape):
        return scale * jax.random.normal(k, shape, dtype=jnp.float32)

    params = {
        "tok_emb": dense(keys[0], (vocab_size, d_model)),
        "pos_emb": dense(keys[1], (max_seq_len, d_model)),
        "proj": jax.random.normal(keys[2], (d_model, embedding_image), dtype=jnp.float32),
        "layers": [],
    }
    for i in range(n_layers):
        lk = jax.random.split(keys[4 + i], 6)
        params["layers"].append({
            "wq": dense(lk[0], (d_model, d_model)), "bq": jnp.zeros((1, d_model), jnp.float32),
            "wk": dense(lk[1], (d_model, d_model)), "bk": jnp.zeros((1, d_model), jnp.float32),
            "wv": dense(lk[2], (d_model, d_model)), "bv": jnp.zeros((1, d_model), jnp.float32),
            "wo": dense(lk[3], (d_model, d_model)), "bo": jnp.zeros((1, d_model), jnp.float32),
            "ln1_g": jnp.ones((1, d_model), jnp.float32), "ln1_b": jnp.zeros((1, d_model), jnp.float32),
            "w1": dense(lk[4], (d_model, ff_dim)), "b1": jnp.zeros((1, ff_dim), jnp.float32),
            "w2": dense(lk[5], (ff_dim, d_model)), "b2": jnp.zeros((1, d_model), jnp.float32),
            "ln2_g": jnp.ones((1, d_model), jnp.float32), "ln2_b": jnp.zeros((1, d_model), jnp.float32),
        })
    return params


def reference_forward(tokens, params, n_heads):
    """Pure-JAX f32 reference (full attention over all tokens), for checking."""
    B, L = tokens.shape
    D = params["tok_emb"].shape[1]
    Dh = D // n_heads
    x = params["tok_emb"][tokens] + params["pos_emb"][None, :L, :]

    lp = params["layers"][-1]
    q = x @ lp["wq"] + lp["bq"]
    k = x @ lp["wk"] + lp["bk"]
    v = x @ lp["wv"] + lp["bv"]

    def split(t):  # (B, L, D) -> (B, H, L, Dh)
        return t.reshape(B, L, n_heads, Dh).transpose(0, 2, 1, 3)

    qh, kh, vh = split(q), split(k), split(v)
    s = jnp.einsum("bhld,bhmd->bhlm", qh, kh) / math.sqrt(Dh)
    p = jax.nn.softmax(s, axis=-1)
    ctx = jnp.einsum("bhlm,bhmd->bhld", p, vh).transpose(0, 2, 1, 3).reshape(B, L, D)
    attn = ctx @ lp["wo"] + lp["bo"]

    h1 = _layer_norm(x + attn, lp["ln1_g"], lp["ln1_b"])
    f = jnp.maximum(h1 @ lp["w1"] + lp["b1"], 0.0) @ lp["w2"] + lp["b2"]
    h2 = _layer_norm(h1 + f, lp["ln2_g"], lp["ln2_b"])

    out = h2[:, -1] @ params["proj"]
    return out / jnp.linalg.norm(out, axis=-1, keepdims=True)


# --------------------------------- main ------------------------------------------
if __name__ == "__main__":
    VOCAB = 50
    D_MODEL = 32
    MAX_SEQ_LEN = 8
    N_LAYERS = 2
    N_HEADS = 4
    EMB_IMAGE = 16
    FF_DIM = 64
    BATCH = 2

    key = jax.random.PRNGKey(0)
    pkey, tkey = jax.random.split(key)
    params = init_params(pkey, VOCAB, D_MODEL, MAX_SEQ_LEN, N_LAYERS, FF_DIM, EMB_IMAGE)
    tokens = jax.random.randint(tkey, (BATCH, MAX_SEQ_LEN), 0, VOCAB, dtype=jnp.int32)

    out = jax.block_until_ready(text_encoder_retrieval_forward(tokens, params, N_HEADS))
    ref = jax.block_until_ready(reference_forward(tokens, params, N_HEADS))

    # bf16 matmul inputs (f32 accumulation) => loosened tolerance vs. f32 reference.
    np.testing.assert_allclose(np.asarray(out), np.asarray(ref), rtol=2e-2, atol=2e-2)

    print("KERNEL_OK")
</pallas_src>

<mosaic_0001>
module attributes {stable_mosaic.version = 11 : i64} {
  func.func @_encoder_last_token_kernel(%arg0: i32, %arg1: memref<8x8x32xbf16, #tpu.memory_space<vmem>>, %arg2: memref<8x32xf32, #tpu.memory_space<vmem>>, %arg3: memref<32x32xbf16, #tpu.memory_space<vmem>>, %arg4: memref<1x32xf32, #tpu.memory_space<vmem>>, %arg5: memref<32x32xbf16, #tpu.memory_space<vmem>>, %arg6: memref<4x32xf32, #tpu.memory_space<vmem>>, %arg7: memref<4x32x32xbf16, #tpu.memory_space<vmem>>, %arg8: memref<1x32xf32, #tpu.memory_space<vmem>>, %arg9: memref<1x32xf32, #tpu.memory_space<vmem>>, %arg10: memref<1x32xf32, #tpu.memory_space<vmem>>, %arg11: memref<32x64xbf16, #tpu.memory_space<vmem>>, %arg12: memref<1x64xf32, #tpu.memory_space<vmem>>, %arg13: memref<64x32xbf16, #tpu.memory_space<vmem>>, %arg14: memref<1x32xf32, #tpu.memory_space<vmem>>, %arg15: memref<1x32xf32, #tpu.memory_space<vmem>>, %arg16: memref<1x32xf32, #tpu.memory_space<vmem>>, %arg17: memref<32x128xbf16, #tpu.memory_space<vmem>>, %arg18: memref<8x128xf32, #tpu.memory_space<vmem>>) attributes {dimension_semantics = [#tpu.dimension_semantics<parallel>], iteration_bounds = array<i64: 1>, scalar_prefetch = 0 : i64, scratch_operands = 0 : i64, tpu.core_type = #tpu.core_type<tc>, window_params = [{transform_indices = @transform_0, window_bounds = array<i64: 8, 8, 32>}, {transform_indices = @transform_1, window_bounds = array<i64: 8, 32>}, {pipeline_mode = #tpu.pipeline_mode<synchronous>, transform_indices = @transform_2, window_bounds = array<i64: 32, 32>}, {pipeline_mode = #tpu.pipeline_mode<synchronous>, transform_indices = @transform_3, window_bounds = array<i64: 1, 32>}, {pipeline_mode = #tpu.pipeline_mode<synchronous>, transform_indices = @transform_4, window_bounds = array<i64: 32, 32>}, {pipeline_mode = #tpu.pipeline_mode<synchronous>, transform_indices = @transform_5, window_bounds = array<i64: 4, 32>}, {pipeline_mode = #tpu.pipeline_mode<synchronous>, transform_indices = @transform_6, window_bounds = array<i64: 4, 32, 32>}, {pipeline_mode = #tpu.pipeline_mode<synchronous>, transform_indices = @transform_7, window_bounds = array<i64: 1, 32>}, {pipeline_mode = #tpu.pipeline_mode<synchronous>, transform_indices = @transform_8, window_bounds = array<i64: 1, 32>}, {pipeline_mode = #tpu.pipeline_mode<synchronous>, transform_indices = @transform_9, window_bounds = array<i64: 1, 32>}, {pipeline_mode = #tpu.pipeline_mode<synchronous>, transform_indices = @transform_10, window_bounds = array<i64: 32, 64>}, {pipeline_mode = #tpu.pipeline_mode<synchronous>, transform_indices = @transform_11, window_bounds = array<i64: 1, 64>}, {pipeline_mode = #tpu.pipeline_mode<synchronous>, transform_indices = @transform_12, window_bounds = array<i64: 64, 32>}, {pipeline_mode = #tpu.pipeline_mode<synchronous>, transform_indices = @transform_13, window_bounds = array<i64: 1, 32>}, {pipeline_mode = #tpu.pipeline_mode<synchronous>, transform_indices = @transform_14, window_bounds = array<i64: 1, 32>}, {pipeline_mode = #tpu.pipeline_mode<synchronous>, transform_indices = @transform_15, window_bounds = array<i64: 1, 32>}, {pipeline_mode = #tpu.pipeline_mode<synchronous>, transform_indices = @transform_16, window_bounds = array<i64: 32, 128>}, {transform_indices = @transform_17, window_bounds = array<i64: 8, 128>}]} {
    %c0 = arith.constant 0 : index
    %c0_0 = arith.constant 0 : index
    %c0_1 = arith.constant 0 : index
    %0 = vector.load %arg1[%c0, %c0_0, %c0_1] : memref<8x8x32xbf16, #tpu.memory_space<vmem>>, vector<8x8x32xbf16>
    %c0_2 = arith.constant 0 : index
    %c0_3 = arith.constant 0 : index
    %1 = vector.load %arg2[%c0_2, %c0_3] : memref<8x32xf32, #tpu.memory_space<vmem>>, vector<8x32xf32>
    %2 = arith.truncf %1 : vector<8x32xf32> to vector<8x32xbf16>
    %c0_4 = arith.constant 0 : index
    %c0_5 = arith.constant 0 : index
    %3 = vector.load %arg3[%c0_4, %c0_5] : memref<32x32xbf16, #tpu.memory_space<vmem>>, vector<32x32xbf16>
    %cst = arith.constant dense<0.000000e+00> : vector<8x32xf32>
    %4 = tpu.matmul %2, %3, %cst {dimension_numbers = #tpu.dot_dimension_numbers<[1], [0], [0], [1], [0, 0, 1, 1], [], []>} : vector<8x32xbf16>, vector<32x32xbf16>, vector<8x32xf32> -> vector<8x32xf32>
    %c0_6 = arith.constant 0 : index
    %c0_7 = arith.constant 0 : index
    %5 = vector.load %arg4[%c0_6, %c0_7] : memref<1x32xf32, #tpu.memory_space<vmem>>, vector<1x32xf32>
    %6 = vector.broadcast %5 : vector<1x32xf32> to vector<8x32xf32>
    %7 = arith.addf %4, %6 : vector<8x32xf32>
    %8 = vector.shape_cast %7 : vector<8x32xf32> to vector<8x1x32xf32>
    %c0_8 = arith.constant 0 : index
    %c0_9 = arith.constant 0 : index
    %9 = vector.load %arg6[%c0_8, %c0_9] : memref<4x32xf32, #tpu.memory_space<vmem>>, vector<4x32xf32>
    %10 = vector.shape_cast %9 : vector<4x32xf32> to vector<1x4x32xf32>
    %11 = vector.broadcast %8 : vector<8x1x32xf32> to vector<8x4x32xf32>
    %12 = vector.broadcast %10 : vector<1x4x32xf32> to vector<8x4x32xf32>
    %13 = arith.mulf %11, %12 : vector<8x4x32xf32>
    %14 = vector.shape_cast %13 : vector<8x4x32xf32> to vector<32x32xf32>
    %15 = arith.truncf %14 : vector<32x32xf32> to vector<32x32xbf16>
    %c0_10 = arith.constant 0 : index
    %c0_11 = arith.constant 0 : index
    %16 = vector.load %arg5[%c0_10, %c0_11] : memref<32x32xbf16, #tpu.memory_space<vmem>>, vector<32x32xbf16>
    %cst_12 = arith.constant dense<0.000000e+00> : vector<32x32xf32>
    %17 = tpu.matmul %15, %16, %cst_12 {dimension_numbers = #tpu.dot_dimension_numbers<[1], [0], [0], [1], [0, 0, 1, 1], [], []>} : vector<32x32xbf16>, vector<32x32xbf16>, vector<32x32xf32> -> vector<32x32xf32>
    %18 = vector.shape_cast %17 : vector<32x32xf32> to vector<8x4x32xf32>
    %19 = arith.truncf %18 : vector<8x4x32xf32> to vector<8x4x32xbf16>
    "tpu.trace_start"() <{level = 10 : i32, message = "bhe,ble->bhl"}> : () -> ()
    %cst_13 = arith.constant dense<0.000000e+00> : vector<8x4x8xf32>
    %20 = tpu.matmul %19, %0, %cst_13 {dimension_numbers = #tpu.dot_dimension_numbers<[2], [2], [1], [1], [0, 0, 0, 1, 1, 1], [0], [0]>} : vector<8x4x32xbf16>, vector<8x8x32xbf16>, vector<8x4x8xf32> -> vector<8x4x8xf32>
    "tpu.trace_stop"() : () -> ()
    %cst_14 = arith.constant dense<0xFF800000> : vector<8x4xf32>
    %21 = vector.multi_reduction <maximumf>, %20, %cst_14 [2] : vector<8x4x8xf32> to vector<8x4xf32>
    %22 = vector.shape_cast %21 : vector<8x4xf32> to vector<8x4x1xf32>
    %23 = vector.broadcast %22 : vector<8x4x1xf32> to vector<8x4x8xf32>
    %24 = arith.subf %20, %23 : vector<8x4x8xf32>
    %25 = math.exp %24 : vector<8x4x8xf32>
    %cst_15 = arith.constant dense<0.000000e+00> : vector<8x4xf32>
    %26 = vector.multi_reduction <add>, %25, %cst_15 [2] : vector<8x4x8xf32> to vector<8x4xf32>
    %27 = vector.shape_cast %26 : vector<8x4xf32> to vector<8x4x1xf32>
    %28 = tpu.reciprocal %27 {approx = true} : vector<8x4x1xf32> -> vector<8x4x1xf32>
    %29 = vector.broadcast %28 : vector<8x4x1xf32> to vector<8x4x8xf32>
    %30 = arith.mulf %25, %29 : vector<8x4x8xf32>
    %31 = arith.truncf %30 : vector<8x4x8xf32> to vector<8x4x8xbf16>
    "tpu.trace_start"() <{level = 10 : i32, message = "bhl,ble->bhe"}> : () -> ()
    %cst_16 = arith.constant dense<0.000000e+00> : vector<8x4x32xf32>
    %32 = tpu.matmul %31, %0, %cst_16 {dimension_numbers = #tpu.dot_dimension_numbers<[2], [1], [1], [2], [0, 0, 0, 1, 1, 2], [0], [0]>} : vector<8x4x8xbf16>, vector<8x8x32xbf16>, vector<8x4x32xf32> -> vector<8x4x32xf32>
    %cst_17 = arith.constant 0.000000e+00 : f32
    "tpu.trace_stop"() : () -> ()
    %33 = vector.broadcast %cst_17 : f32 to vector<8x32xf32>
    %34 = vector.extract_strided_slice %32 {offsets = [0, 0, 0], sizes = [8, 1, 32], strides = [1, 1, 1]} : vector<8x4x32xf32> to vector<8x1x32xf32>
    %35 = vector.shape_cast %34 : vector<8x1x32xf32> to vector<8x32xf32>
    %36 = arith.truncf %35 : vector<8x32xf32> to vector<8x32xbf16>
    %c0_18 = arith.constant 0 : index
    %c0_19 = arith.constant 0 : index
    %c0_20 = arith.constant 0 : index
    %37 = vector.load %arg7[%c0_18, %c0_19, %c0_20] : memref<4x32x32xbf16, #tpu.memory_space<vmem>>, vector<1x32x32xbf16>
    %38 = vector.shape_cast %37 : vector<1x32x32xbf16> to vector<32x32xbf16>
    %cst_21 = arith.constant dense<0.000000e+00> : vector<8x32xf32>
    %39 = tpu.matmul %36, %38, %cst_21 {dimension_numbers = #tpu.dot_dimension_numbers<[1], [0], [0], [1], [0, 0, 1, 1], [], []>} : vector<8x32xbf16>, vector<32x32xbf16>, vector<8x32xf32> -> vector<8x32xf32>
    %40 = arith.addf %33, %39 : vector<8x32xf32>
    %41 = vector.extract_strided_slice %32 {offsets = [0, 1, 0], sizes = [8, 1, 32], strides = [1, 1, 1]} : vector<8x4x32xf32> to vector<8x1x32xf32>
    %42 = vector.shape_cast %41 : vector<8x1x32xf32> to vector<8x32xf32>
    %43 = arith.truncf %42 : vector<8x32xf32> to vector<8x32xbf16>
    %c1 = arith.constant 1 : index
    %c0_22 = arith.constant 0 : index
    %c0_23 = arith.constant 0 : index
    %44 = vector.load %arg7[%c1, %c0_22, %c0_23] : memref<4x32x32xbf16, #tpu.memory_space<vmem>>, vector<1x32x32xbf16>
    %45 = vector.shape_cast %44 : vector<1x32x32xbf16> to vector<32x32xbf16>
    %cst_24 = arith.constant dense<0.000000e+00> : vector<8x32xf32>
    %46 = tpu.matmul %43, %45, %cst_24 {dimension_numbers = #tpu.dot_dimension_numbers<[1], [0], [0], [1], [0, 0, 1, 1], [], []>} : vector<8x32xbf16>, vector<32x32xbf16>, vector<8x32xf32> -> vector<8x32xf32>
    %47 = arith.addf %40, %46 : vector<8x32xf32>
    %48 = vector.extract_strided_slice %32 {offsets = [0, 2, 0], sizes = [8, 1, 32], strides = [1, 1, 1]} : vector<8x4x32xf32> to vector<8x1x32xf32>
    %49 = vector.shape_cast %48 : vector<8x1x32xf32> to vector<8x32xf32>
    %50 = arith.truncf %49 : vector<8x32xf32> to vector<8x32xbf16>
    %c2 = arith.constant 2 : index
    %c0_25 = arith.constant 0 : index
    %c0_26 = arith.constant 0 : index
    %51 = vector.load %arg7[%c2, %c0_25, %c0_26] : memref<4x32x32xbf16, #tpu.memory_space<vmem>>, vector<1x32x32xbf16>
    %52 = vector.shape_cast %51 : vector<1x32x32xbf16> to vector<32x32xbf16>
    %cst_27 = arith.constant dense<0.000000e+00> : vector<8x32xf32>
    %53 = tpu.matmul %50, %52, %cst_27 {dimension_numbers = #tpu.dot_dimension_numbers<[1], [0], [0], [1], [0, 0, 1, 1], [], []>} : vector<8x32xbf16>, vector<32x32xbf16>, vector<8x32xf32> -> vector<8x32xf32>
    %54 = arith.addf %47, %53 : vector<8x32xf32>
    %55 = vector.extract_strided_slice %32 {offsets = [0, 3, 0], sizes = [8, 1, 32], strides = [1, 1, 1]} : vector<8x4x32xf32> to vector<8x1x32xf32>
    %56 = vector.shape_cast %55 : vector<8x1x32xf32> to vector<8x32xf32>
    %57 = arith.truncf %56 : vector<8x32xf32> to vector<8x32xbf16>
    %c3 = arith.constant 3 : index
    %c0_28 = arith.constant 0 : index
    %c0_29 = arith.constant 0 : index
    %58 = vector.load %arg7[%c3, %c0_28, %c0_29] : memref<4x32x32xbf16, #tpu.memory_space<vmem>>, vector<1x32x32xbf16>
    %59 = vector.shape_cast %58 : vector<1x32x32xbf16> to vector<32x32xbf16>
    %cst_30 = arith.constant dense<0.000000e+00> : vector<8x32xf32>
    %60 = tpu.matmul %57, %59, %cst_30 {dimension_numbers = #tpu.dot_dimension_numbers<[1], [0], [0], [1], [0, 0, 1, 1], [], []>} : vector<8x32xbf16>, vector<32x32xbf16>, vector<8x32xf32> -> vector<8x32xf32>
    %61 = arith.addf %54, %60 : vector<8x32xf32>
    %c0_31 = arith.constant 0 : index
    %c0_32 = arith.constant 0 : index
    %62 = vector.load %arg8[%c0_31, %c0_32] : memref<1x32xf32, #tpu.memory_space<vmem>>, vector<1x32xf32>
    %63 = vector.broadcast %62 : vector<1x32xf32> to vector<8x32xf32>
    %64 = arith.addf %61, %63 : vector<8x32xf32>
    %65 = arith.addf %1, %64 : vector<8x32xf32>
    %c0_33 = arith.constant 0 : index
    %c0_34 = arith.constant 0 : index
    %66 = vector.load %arg9[%c0_33, %c0_34] : memref<1x32xf32, #tpu.memory_space<vmem>>, vector<1x32xf32>
    %c0_35 = arith.constant 0 : index
    %c0_36 = arith.constant 0 : index
    %67 = vector.load %arg10[%c0_35, %c0_36] : memref<1x32xf32, #tpu.memory_space<vmem>>, vector<1x32xf32>
    %cst_37 = arith.constant dense<0.000000e+00> : vector<8xf32>
    %68 = vector.multi_reduction <add>, %65, %cst_37 [1] : vector<8x32xf32> to vector<8xf32>
    %69 = vector.shape_cast %68 : vector<8xf32> to vector<8x1xf32>
    %cst_38 = arith.constant 3.200000e+01 : f32
    %70 = vector.broadcast %cst_38 : f32 to vector<8x1xf32>
    %71 = arith.divf %69, %70 : vector<8x1xf32>
    %72 = vector.broadcast %71 : vector<8x1xf32> to vector<8x32xf32>
    %73 = arith.subf %65, %72 : vector<8x32xf32>
    %74 = arith.mulf %73, %73 : vector<8x32xf32>
    %cst_39 = arith.constant dense<0.000000e+00> : vector<8xf32>
    %75 = vector.multi_reduction <add>, %74, %cst_39 [1] : vector<8x32xf32> to vector<8xf32>
    %76 = vector.shape_cast %75 : vector<8xf32> to vector<8x1xf32>
    %cst_40 = arith.constant 3.200000e+01 : f32
    %77 = vector.broadcast %cst_40 : f32 to vector<8x1xf32>
    %78 = arith.divf %76, %77 : vector<8x1xf32>
    %79 = vector.broadcast %71 : vector<8x1xf32> to vector<8x32xf32>
    %80 = arith.subf %65, %79 : vector<8x32xf32>
    %cst_41 = arith.constant 9.99999974E-6 : f32
    %81 = vector.broadcast %cst_41 : f32 to vector<8x1xf32>
    %82 = arith.addf %78, %81 : vector<8x1xf32>
    %83 = math.rsqrt %82 : vector<8x1xf32>
    %84 = vector.broadcast %83 : vector<8x1xf32> to vector<8x32xf32>
    %85 = arith.mulf %80, %84 : vector<8x32xf32>
    %86 = vector.broadcast %66 : vector<1x32xf32> to vector<8x32xf32>
    %87 = arith.mulf %85, %86 : vector<8x32xf32>
    %88 = vector.broadcast %67 : vector<1x32xf32> to vector<8x32xf32>
    %89 = arith.addf %87, %88 : vector<8x32xf32>
    %90 = arith.truncf %89 : vector<8x32xf32> to vector<8x32xbf16>
    %c0_42 = arith.constant 0 : index
    %c0_43 = arith.constant 0 : index
    %91 = vector.load %arg11[%c0_42, %c0_43] : memref<32x64xbf16, #tpu.memory_space<vmem>>, vector<32x64xbf16>
    %cst_44 = arith.constant dense<0.000000e+00> : vector<8x64xf32>
    %92 = tpu.matmul %90, %91, %cst_44 {dimension_numbers = #tpu.dot_dimension_numbers<[1], [0], [0], [1], [0, 0, 1, 1], [], []>} : vector<8x32xbf16>, vector<32x64xbf16>, vector<8x64xf32> -> vector<8x64xf32>
    %c0_45 = arith.constant 0 : index
    %c0_46 = arith.constant 0 : index
    %93 = vector.load %arg12[%c0_45, %c0_46] : memref<1x64xf32, #tpu.memory_space<vmem>>, vector<1x64xf32>
    %94 = vector.broadcast %93 : vector<1x64xf32> to vector<8x64xf32>
    %95 = arith.addf %92, %94 : vector<8x64xf32>
    %cst_47 = arith.constant 0.000000e+00 : f32
    %96 = vector.broadcast %cst_47 : f32 to vector<8x64xf32>
    %97 = arith.maximumf %95, %96 : vector<8x64xf32>
    %98 = arith.truncf %97 : vector<8x64xf32> to vector<8x64xbf16>
    %c0_48 = arith.constant 0 : index
    %c0_49 = arith.constant 0 : index
    %99 = vector.load %arg13[%c0_48, %c0_49] : memref<64x32xbf16, #tpu.memory_space<vmem>>, vector<64x32xbf16>
    %cst_50 = arith.constant dense<0.000000e+00> : vector<8x32xf32>
    %100 = tpu.matmul %98, %99, %cst_50 {dimension_numbers = #tpu.dot_dimension_numbers<[1], [0], [0], [1], [0, 0, 1, 1], [], []>} : vector<8x64xbf16>, vector<64x32xbf16>, vector<8x32xf32> -> vector<8x32xf32>
    %c0_51 = arith.constant 0 : index
    %c0_52 = arith.constant 0 : index
    %101 = vector.load %arg14[%c0_51, %c0_52] : memref<1x32xf32, #tpu.memory_space<vmem>>, vector<1x32xf32>
    %102 = vector.broadcast %101 : vector<1x32xf32> to vector<8x32xf32>
    %103 = arith.addf %100, %102 : vector<8x32xf32>
    %104 = arith.addf %89, %103 : vector<8x32xf32>
    %c0_53 = arith.constant 0 : index
    %c0_54 = arith.constant 0 : index
    %105 = vector.load %arg15[%c0_53, %c0_54] : memref<1x32xf32, #tpu.memory_space<vmem>>, vector<1x32xf32>
    %c0_55 = arith.constant 0 : index
    %c0_56 = arith.constant 0 : index
    %106 = vector.load %arg16[%c0_55, %c0_56] : memref<1x32xf32, #tpu.memory_space<vmem>>, vector<1x32xf32>
    %cst_57 = arith.constant dense<0.000000e+00> : vector<8xf32>
    %107 = vector.multi_reduction <add>, %104, %cst_57 [1] : vector<8x32xf32> to vector<8xf32>
    %108 = vector.shape_cast %107 : vector<8xf32> to vector<8x1xf32>
    %cst_58 = arith.constant 3.200000e+01 : f32
    %109 = vector.broadcast %cst_58 : f32 to vector<8x1xf32>
    %110 = arith.divf %108, %109 : vector<8x1xf32>
    %111 = vector.broadcast %110 : vector<8x1xf32> to vector<8x32xf32>
    %112 = arith.subf %104, %111 : vector<8x32xf32>
    %113 = arith.mulf %112, %112 : vector<8x32xf32>
    %cst_59 = arith.constant dense<0.000000e+00> : vector<8xf32>
    %114 = vector.multi_reduction <add>, %113, %cst_59 [1] : vector<8x32xf32> to vector<8xf32>
    %115 = vector.shape_cast %114 : vector<8xf32> to vector<8x1xf32>
    %cst_60 = arith.constant 3.200000e+01 : f32
    %116 = vector.broadcast %cst_60 : f32 to vector<8x1xf32>
    %117 = arith.divf %115, %116 : vector<8x1xf32>
    %118 = vector.broadcast %110 : vector<8x1xf32> to vector<8x32xf32>
    %119 = arith.subf %104, %118 : vector<8x32xf32>
    %cst_61 = arith.constant 9.99999974E-6 : f32
    %120 = vector.broadcast %cst_61 : f32 to vector<8x1xf32>
    %121 = arith.addf %117, %120 : vector<8x1xf32>
    %122 = math.rsqrt %121 : vector<8x1xf32>
    %123 = vector.broadcast %122 : vector<8x1xf32> to vector<8x32xf32>
    %124 = arith.mulf %119, %123 : vector<8x32xf32>
    %125 = vector.broadcast %105 : vector<1x32xf32> to vector<8x32xf32>
    %126 = arith.mulf %124, %125 : vector<8x32xf32>
    %127 = vector.broadcast %106 : vector<1x32xf32> to vector<8x32xf32>
    %128 = arith.addf %126, %127 : vector<8x32xf32>
    %129 = arith.truncf %128 : vector<8x32xf32> to vector<8x32xbf16>
    %c0_62 = arith.constant 0 : index
    %c0_63 = arith.constant 0 : index
    %130 = vector.load %arg17[%c0_62, %c0_63] : memref<32x128xbf16, #tpu.memory_space<vmem>>, vector<32x128xbf16>
    %cst_64 = arith.constant dense<0.000000e+00> : vector<8x128xf32>
    %131 = tpu.matmul %129, %130, %cst_64 {dimension_numbers = #tpu.dot_dimension_numbers<[1], [0], [0], [1], [0, 0, 1, 1], [], []>} : vector<8x32xbf16>, vector<32x128xbf16>, vector<8x128xf32> -> vector<8x128xf32>
    %132 = arith.mulf %131, %131 : vector<8x128xf32>
    %cst_65 = arith.constant dense<0.000000e+00> : vector<8xf32>
    %133 = vector.multi_reduction <add>, %132, %cst_65 [1] : vector<8x128xf32> to vector<8xf32>
    %134 = vector.shape_cast %133 : vector<8xf32> to vector<8x1xf32>
    %cst_66 = arith.constant 9.99999996E-13 : f32
    %135 = vector.broadcast %cst_66 : f32 to vector<8x1xf32>
    %136 = arith.addf %134, %135 : vector<8x1xf32>
    %137 = math.rsqrt %136 : vector<8x1xf32>
    %138 = vector.broadcast %137 : vector<8x1xf32> to vector<8x128xf32>
    %139 = arith.mulf %131, %138 : vector<8x128xf32>
    %c0_67 = arith.constant 0 : index
    %c0_68 = arith.constant 0 : index
    %140 = vector.load %arg18[%c0_67, %c0_68] : memref<8x128xf32, #tpu.memory_space<vmem>>, vector<8x128xf32>
    tpu.vector_store %arg18[%c0_67, %c0_68], %139 {strides = array<i32>} : memref<8x128xf32, #tpu.memory_space<vmem>>, vector<8x128xf32>,
    return
  }
  func.func @transform_0(%arg0: i32) -> (i32, i32, i32) {
    %c0_i32 = arith.constant 0 : i32
    %c0_i32_0 = arith.constant 0 : i32
    %c0_i32_1 = arith.constant 0 : i32
    return %arg0, %c0_i32, %c0_i32_0 : i32, i32, i32
  }
  func.func @transform_1(%arg0: i32) -> (i32, i32) {
    %c0_i32 = arith.constant 0 : i32
    %c0_i32_0 = arith.constant 0 : i32
    return %arg0, %c0_i32 : i32, i32
  }
  func.func @transform_2(%arg0: i32) -> (i32, i32) {
    %c0_i32 = arith.constant 0 : i32
    %c0_i32_0 = arith.constant 0 : i32
    %c0_i32_1 = arith.constant 0 : i32
    return %c0_i32, %c0_i32_0 : i32, i32
  }
  func.func @transform_3(%arg0: i32) -> (i32, i32) {
    %c0_i32 = arith.constant 0 : i32
    %c0_i32_0 = arith.constant 0 : i32
    %c0_i32_1 = arith.constant 0 : i32
    return %c0_i32, %c0_i32_0 : i32, i32
  }
  func.func @transform_4(%arg0: i32) -> (i32, i32) {
    %c0_i32 = arith.constant 0 : i32
    %c0_i32_0 = arith.constant 0 : i32
    %c0_i32_1 = arith.constant 0 : i32
    return %c0_i32, %c0_i32_0 : i32, i32
  }
  func.func @transform_5(%arg0: i32) -> (i32, i32) {
    %c0_i32 = arith.constant 0 : i32
    %c0_i32_0 = arith.constant 0 : i32
    %c0_i32_1 = arith.constant 0 : i32
    return %c0_i32, %c0_i32_0 : i32, i32
  }
  func.func @transform_6(%arg0: i32) -> (i32, i32, i32) {
    %c0_i32 = arith.constant 0 : i32
    %c0_i32_0 = arith.constant 0 : i32
    %c0_i32_1 = arith.constant 0 : i32
    %c0_i32_2 = arith.constant 0 : i32
    return %c0_i32, %c0_i32_0, %c0_i32_1 : i32, i32, i32
  }
  func.func @transform_7(%arg0: i32) -> (i32, i32) {
    %c0_i32 = arith.constant 0 : i32
    %c0_i32_0 = arith.constant 0 : i32
    %c0_i32_1 = arith.constant 0 : i32
    return %c0_i32, %c0_i32_0 : i32, i32
  }
  func.func @transform_8(%arg0: i32) -> (i32, i32) {
    %c0_i32 = arith.constant 0 : i32
    %c0_i32_0 = arith.constant 0 : i32
    %c0_i32_1 = arith.constant 0 : i32
    return %c0_i32, %c0_i32_0 : i32, i32
  }
  func.func @transform_9(%arg0: i32) -> (i32, i32) {
    %c0_i32 = arith.constant 0 : i32
    %c0_i32_0 = arith.constant 0 : i32
    %c0_i32_1 = arith.constant 0 : i32
    return %c0_i32, %c0_i32_0 : i32, i32
  }
  func.func @transform_10(%arg0: i32) -> (i32, i32) {
    %c0_i32 = arith.constant 0 : i32
    %c0_i32_0 = arith.constant 0 : i32
    %c0_i32_1 = arith.constant 0 : i32
    return %c0_i32, %c0_i32_0 : i32, i32
  }
  func.func @transform_11(%arg0: i32) -> (i32, i32) {
    %c0_i32 = arith.constant 0 : i32
    %c0_i32_0 = arith.constant 0 : i32
    %c0_i32_1 = arith.constant 0 : i32
    return %c0_i32, %c0_i32_0 : i32, i32
  }
  func.func @transform_12(%arg0: i32) -> (i32, i32) {
    %c0_i32 = arith.constant 0 : i32
    %c0_i32_0 = arith.constant 0 : i32
    %c0_i32_1 = arith.constant 0 : i32
    return %c0_i32, %c0_i32_0 : i32, i32
  }
  func.func @transform_13(%arg0: i32) -> (i32, i32) {
    %c0_i32 = arith.constant 0 : i32
    %c0_i32_0 = arith.constant 0 : i32
    %c0_i32_1 = arith.constant 0 : i32
    return %c0_i32, %c0_i32_0 : i32, i32
  }
  func.func @transform_14(%arg0: i32) -> (i32, i32) {
    %c0_i32 = arith.constant 0 : i32
    %c0_i32_0 = arith.constant 0 : i32
    %c0_i32_1 = arith.constant 0 : i32
    return %c0_i32, %c0_i32_0 : i32, i32
  }
  func.func @transform_15(%arg0: i32) -> (i32, i32) {
    %c0_i32 = arith.constant 0 : i32
    %c0_i32_0 = arith.constant 0 : i32
    %c0_i32_1 = arith.constant 0 : i32
    return %c0_i32, %c0_i32_0 : i32, i32
  }
  func.func @transform_16(%arg0: i32) -> (i32, i32) {
    %c0_i32 = arith.constant 0 : i32
    %c0_i32_0 = arith.constant 0 : i32
    %c0_i32_1 = arith.constant 0 : i32
    return %c0_i32, %c0_i32_0 : i32, i32
  }
  func.func @transform_17(%arg0: i32) -> (i32, i32) {
    %c0_i32 = arith.constant 0 : i32
    %c0_i32_0 = arith.constant 0 : i32
    return %arg0, %c0_i32 : i32, i32
  }
}

</mosaic_0001>

<bundles_post_ra>
// kernel: tpu_custom_call.1
= control target key start
LH: loop header
LB: loop body
LE: loop exit
PB: predicated region body
PF: predicated region fallthrough
CT: control target
= control target key end

     0   :  { %s2936_s0 = inlined_call_operand.vmem [shape: bf16[8,8,32], index: 0, kind: input, shape index: {}]   ;;  %s2937_s1 = inlined_call_operand.hbm [shape: f32[8,32], index: 1, kind: input, shape index: {}]   ;;  %s2938_s2 = inlined_call_operand.vmem [shape: bf16[32,32], index: 2, kind: input, shape index: {}]   ;;  %s2939_s3 = inlined_call_operand.vmem [shape: f32[1,32], index: 3, kind: input, shape index: {}]   ;;  %s2940_s4 = inlined_call_operand.hbm [shape: bf16[32,32], index: 4, kind: input, shape index: {}]   ;;  %s2941_s5 = inlined_call_operand.vmem [shape: f32[4,32], index: 5, kind: input, shape index: {}]   ;;  %s2942_s6 = inlined_call_operand.hbm [shape: bf16[4,32,32], index: 6, kind: input, shape index: {}]   ;;  %s2943_s7 = inlined_call_operand.hbm [shape: f32[1,32], index: 7, kind: input, shape index: {}]   ;;  %s2944_s8 = inlined_call_operand.hbm [shape: f32[1,32], index: 8, kind: input, shape index: {}]   ;;  %s2945_s9 = inlined_call_operand.hbm [shape: f32[1,32], index: 9, kind: input, shape index: {}]   ;;  %s2946_s10 = inlined_call_operand.hbm [shape: bf16[32,64], index: 10, kind: input, shape index: {}]   ;;  %s2947_s11 = inlined_call_operand.hbm [shape: f32[1,64], index: 11, kind: input, shape index: {}]   ;;  %s2948_s12 = inlined_call_operand.vmem [shape: bf16[64,32], index: 12, kind: input, shape index: {}]   ;;  %s2949_s13 = inlined_call_operand.vmem [shape: f32[1,32], index: 13, kind: input, shape index: {}]   ;;  %s2950_s14 = inlined_call_operand.vmem [shape: f32[1,32], index: 14, kind: input, shape index: {}]   ;;  %s2951_s15 = inlined_call_operand.vmem [shape: f32[1,32], index: 15, kind: input, shape index: {}]   ;;  %s2952_s16 = inlined_call_operand.hbm [shape: bf16[32,128], index: 16, kind: input, shape index: {}]   ;;  %s2953_s17 = inlined_call_operand.hbm [shape: f32[8,128], index: 17, kind: output, shape index: {}]  }
   0x1   :  { %2955 = sst [smem:[#allocation24_spill]] %s2936_s0 }
   0x2   :  { %2956 = sst [smem:[#allocation25_spill]] %s2937_s1 }
   0x3   :  { %22 = vsyncpa [#allocation3], 0 }
   0x4   :  { %23 = vsyncpa [#allocation6], 0 }
   0x5   :  { %24 = vsyncpa [#allocation9], 0 }
   0x6   :  { %25 = vsyncpa [#allocation12], 0 }
   0x7   :  { %26 = vsyncpa [#allocation15], 0 }
   0x8   :  { %27 = vsyncpa [#allocation4], 0  ;;  %s2495_s24 = smov [#allocation5]  }
   0x9   :  { %s49_s25 = sshll.u32 %s2495_s24, 4  ;;  %s50_s25 = int_to_ptr.vmem [resolvable:$true] %s49_s25 }
   0xa   :  { %s2291_s26 = scalar_lea.vmem %s50_s25, 256  ;;  %p2296_p1 = scmp.lt.s32.totalorder %s50_s25, %s50_s25 }
   0xb   :  { %p2292_p0 = scmp.ne.s32.totalorder %s50_s25, %s2291_s26  ;;  %p2297_p2 = scmp.lt.s32.totalorder %s2291_s26, %s2291_s26 }
   0xd   :  { %p2298_p3 = por %p2297_p2, %p2296_p1 }
   0xf   :  { %p2299_p4 = pnand %p2298_p3, %p2292_p0 }
  0x11   :  { %2302 = shalt.err (!%p2299_p4)
}
  0x12   :  { %s2496_s27 = smov 64   ;;  %s2497_s28 = smov 4  }
  0x13   :  { %55 = dma.hbm_to_vmem [thread:$0]  %s2940_s4, 256, %s50_s25, [#allocation6], %s2496_s27, %s2496_s27, %s2497_s28  }
  0x14   :  { %s2498_s30 = smov [#allocation8]   ;;  %s2499_s19 = smov [#allocation11]  }
  0x15   :  { %s76_s18 = sshll.u32 %s2498_s30, 4  ;;  %s96_s1 = sshll.u32 %s2499_s19, 4  ;;  %s77_s18 = int_to_ptr.vmem [resolvable:$true] %s76_s18  ;;  %s97_s1 = int_to_ptr.vmem [resolvable:$true] %s96_s1 }
  0x16   :  { %s2311_s20 = scalar_lea.vmem %s77_s18, 16  ;;  %s2315_s21 = scalar_lea.vmem %s77_s18, 32 }
  0x17   :  { %p2312_p5 = scmp.ne.s32.totalorder %s77_s18, %s2311_s20  ;;  %p2316_p6 = scmp.lt.s32.totalorder %s77_s18, %s77_s18 }
  0x18   :  { %p2317_p7 = scmp.lt.s32.totalorder %s2315_s21, %s2311_s20 }
  0x1a   :  { %p2318_p8 = por %p2317_p7, %p2316_p6 }
  0x1c   :  { %p2319_p9 = pnand %p2318_p8, %p2312_p5 }
  0x1e   :  { %2322 = shalt.err (!%p2319_p9)
}
  0x1f   :  { %79 = dma.hbm_to_vmem [thread:$0]  %s2943_s7, 16, %s77_s18, [#allocation9]  }
  0x20   :  { %s2331_s24 = scalar_lea.vmem %s97_s1, 16  ;;  %s2335_s4 = scalar_lea.vmem %s97_s1, 32 }
  0x21   :  { %p2332_p10 = scmp.ne.s32.totalorder %s97_s1, %s2331_s24  ;;  %p2336_p11 = scmp.lt.s32.totalorder %s97_s1, %s97_s1 }
  0x22   :  { %p2337_p12 = scmp.lt.s32.totalorder %s2335_s4, %s2331_s24 }
  0x24   :  { %p2338_p13 = por %p2337_p12, %p2336_p11 }
  0x26   :  { %p2339_p0 = pnand %p2338_p13, %p2332_p10 }
  0x28   :  { %2342 = shalt.err (!%p2339_p0)
}
  0x29   :  { %99 = dma.hbm_to_vmem [thread:$0]  %s2945_s9, 16, %s97_s1, [#allocation12]  }
  0x2a   :  { %s2500_s29 = smov [#allocation14]   ;;  %s2501_s30 = smov [#allocation2]  }
  0x2b   :  { %s118_s0 = sshll.u32 %s2500_s29, 4  ;;  %s36_s19 = sshll.u32 %s2501_s30, 4  ;;  %s119_s0 = int_to_ptr.vmem [resolvable:$true] %s118_s0  ;;  %s37_s19 = int_to_ptr.vmem [resolvable:$true] %s36_s19 }
  0x2c   :  { %s2351_s20 = scalar_lea.vmem %s119_s0, 16  ;;  %s2355_s7 = scalar_lea.vmem %s119_s0, 32 }
  0x2d   :  { %p2352_p1 = scmp.ne.s32.totalorder %s119_s0, %s2351_s20  ;;  %p2356_p2 = scmp.lt.s32.totalorder %s119_s0, %s119_s0 }
  0x2e   :  { %p2357_p3 = scmp.lt.s32.totalorder %s2355_s7, %s2351_s20 }
  0x30   :  { %p2358_p4 = por %p2357_p3, %p2356_p2 }
  0x32   :  { %p2359_p5 = pnand %p2358_p4, %p2352_p1 }
  0x34   :  { %2362 = shalt.err (!%p2359_p5)
}
  0x35   :  { %121 = dma.hbm_to_vmem [thread:$0]  %s2947_s11, 16, %s119_s0, [#allocation15]  }
  0x36   :  { %s2371_s22 = scalar_lea.vmem %s37_s19, 128  ;;  %p2376_p7 = scmp.lt.s32.totalorder %s37_s19, %s37_s19 }
  0x37   :  { %p2372_p6 = scmp.ne.s32.totalorder %s37_s19, %s2371_s22  ;;  %p2377_p8 = scmp.lt.s32.totalorder %s2371_s22, %s2371_s22 }
  0x39   :  { %p2378_p9 = por %p2377_p8, %p2376_p7 }
  0x3b   :  { %p2379_p10 = pnand %p2378_p9, %p2372_p6 }
  0x3d   :  { %2382 = shalt.err (!%p2379_p10)
}
  0x3e   :  { %s2957_s23 = sld [smem:[#allocation25_spill]]  ;;  %s2502_s24 = smov [#allocation7]  }
  0x3f   :  { %s63_s4 = sshll.u32 %s2502_s24, 4  ;;  %s2503_s25 = smov [#allocation10]   ;;  %s64_s4 = int_to_ptr.vmem [resolvable:$true] %s63_s4 }
  0x40   :  { %s86_s26 = sshll.u32 %s2503_s25, 4  ;;  %s2391_s29 = scalar_lea.vmem %s64_s4, 1024  ;;  %s87_s26 = int_to_ptr.vmem [resolvable:$true] %s86_s26 }
  0x41   :  { %p2392_p11 = scmp.ne.s32.totalorder %s64_s4, %s2391_s29  ;;  %p2396_p12 = scmp.lt.s32.totalorder %s64_s4, %s64_s4 }
  0x42   :  { %p2397_p13 = scmp.lt.s32.totalorder %s2391_s29, %s2391_s29 }
  0x44   :  { %39 = dma.hbm_to_vmem [thread:$0]  %s2957_s23, 128, %s37_s19, [#allocation3]  }
  0x45   :  { %p2398_p0 = por %p2397_p13, %p2396_p12 }
  0x47   :  { %p2399_p1 = pnand %p2398_p0, %p2392_p11 }
  0x49   :  { %2402 = shalt.err (!%p2399_p1)
}
  0x4a   :  { %69 = dma.hbm_to_vmem [thread:$0]  %s2942_s6, 1024, %s64_s4, [#allocation6], %s2496_s27, %s2496_s27, %s2497_s28  }
  0x4b   :  { %s2411_s30 = scalar_lea.vmem %s87_s26, 16  ;;  %s2415_s19 = scalar_lea.vmem %s87_s26, 32 }
  0x4c   :  { %p2412_p2 = scmp.ne.s32.totalorder %s87_s26, %s2411_s30  ;;  %p2416_p3 = scmp.lt.s32.totalorder %s87_s26, %s87_s26 }
  0x4d   :  { %p2417_p4 = scmp.lt.s32.totalorder %s2415_s19, %s2411_s30 }
  0x4f   :  { %p2418_p5 = por %p2417_p4, %p2416_p3 }
  0x51   :  { %p2419_p6 = pnand %p2418_p5, %p2412_p2 }
  0x53   :  { %2422 = shalt.err (!%p2419_p6)
}
  0x54   :  { %89 = dma.hbm_to_vmem [thread:$0]  %s2944_s8, 16, %s87_s26, [#allocation9]  }
  0x55   :  { %s2504_s18 = smov [#allocation13]   ;;  %s2505_s22 = smov [#allocation16]  }
  0x56   :  { %s105_s21 = sshll.u32 %s2504_s18, 4  ;;  %s135_s9 = sshll.u32 %s2505_s22, 4  ;;  %s106_s21 = int_to_ptr.vmem [resolvable:$true] %s105_s21  ;;  %s136_s9 = int_to_ptr.vmem [resolvable:$true] %s135_s9 }
  0x57   :  { %s2431_s1 = scalar_lea.vmem %s106_s21, 256  ;;  %p2436_p8 = scmp.lt.s32.totalorder %s106_s21, %s106_s21 }
  0x58   :  { %p2432_p7 = scmp.ne.s32.totalorder %s106_s21, %s2431_s1  ;;  %p2437_p9 = scmp.lt.s32.totalorder %s2431_s1, %s2431_s1 }
  0x5a   :  { %p2438_p10 = por %p2437_p9, %p2436_p8 }
  0x5c   :  { %p2439_p11 = pnand %p2438_p10, %p2432_p7 }
  0x5e   :  { %2442 = shalt.err (!%p2439_p11)
}
  0x5f   :  { %111 = dma.hbm_to_vmem [thread:$0]  %s2946_s10, 256, %s106_s21, [#allocation12], %s2496_s27, %s2496_s27, %s2497_s28  }
  0x60   :  { %s2451_s8 = scalar_lea.vmem %s136_s9, 256  ;;  %p2456_p13 = scmp.lt.s32.totalorder %s136_s9, %s136_s9 }
  0x61   :  { %p2452_p12 = scmp.ne.s32.totalorder %s136_s9, %s2451_s8  ;;  %p2457_p0 = scmp.lt.s32.totalorder %s2451_s8, %s2451_s8 }
  0x63   :  { %p2458_p1 = por %p2457_p0, %p2456_p13 }
  0x65   :  { %p2459_p2 = pnand %p2458_p1, %p2452_p12 }
  0x67   :  { %2462 = shalt.err (!%p2459_p2)
}
  0x68   :  { %141 = dma.hbm_to_vmem [thread:$0]  %s2952_s16, 256, %s136_s9, [#allocation15], %s2496_s27, %s2496_s27, %s2497_s28  }
  0x69   :  { %2483 = dma.done.wait [#allocation3], 128  }
  0x6a   :  { %2484 = vsyncadd [#allocation3], 4294967168 }
  0x6b   :  { %2485 = dma.done.wait [#allocation6], 1280  }
  0x6c   :  { %2486 = vsyncadd [#allocation6], 4294966016 }
  0x6d   :  { %2487 = dma.done.wait [#allocation9], 32  }
  0x6e   :  { %2488 = vsyncadd [#allocation9], 4294967264 }
  0x6f   :  { %2489 = dma.done.wait [#allocation12], 272  }
  0x70   :  { %2490 = vsyncadd [#allocation12], 4294967024 }
  0x71   :  { %2491 = dma.done.wait [#allocation15], 272  }
  0x72   :  { %2492 = vsyncadd [#allocation15], 4294967024  ;;  %v2506_v0 = vmov 0.0   ;;  %vm2507_vm0 = vmmov 0   ;;  %v2224_v1 = vld [vmem:[%s2938_s2 + $0x8] sm:$0xff]   ;;  %v2225_v2 = vld [vmem:[%s2938_s2] sm:$0xff]   ;;  %v252_v11 = vlaneseq }
  0x73   :  { %2037 = vmatprep.subr.bf16.mxu0 %v2506_v0  ;;  %2041 = vmatprep.mubr.msk.bf16.mxu0 %vm2507_vm0, %v2506_v0  ;;  %v178_v3 = vld [vmem:[#allocation2] sm:$0xff]  ;;  %vm203_vm1 = vcmask 261120   ;;  %v2226_v5 = vld [vmem:[#allocation5 + $0x8] sm:$0xff]   ;;  %v2227_v6 = vld [vmem:[#allocation5] sm:$0xff]   ;;  %s2958_s26 = sld [smem:[#allocation24_spill]]  ;;  %vm823_vm2 = vcmask 60416  }
  0x74   :  { %2038 = vmatpush3.bf16.msra.mxu0 %v2224_v1  ;;  %v179_v4 = vpack.c.bf16 %v178_v3, %v178_v3  ;;  %2045 = vmatprep.subr.bf16.mxu1 %v2226_v5  ;;  %v2508_v9 = vmov 1966171168   ;;  %v253_v13 = vshrl.u32 %v252_v11, 7  ;;  %v1921_v14 = vld [vmem:[%s2939_s3] ss:$0 sm:$0xff]  ;;  %vm924_vm3 = vcmask 1043456  }
  0x75   :  { %2039 = vmatprep.subr.bf16.mxu0 %v2506_v0  ;;  %2046 = vmatpush3.bf16.msra.mxu1 %v2226_v5  ;;  %v250_v10 = vunpack.c.l.s4 %v2508_v9  ;;  %v297_v38 = vld [vmem:[%s2941_s5] sm:$0xf]  ;;  %vm920_vm4 = vcmask 64512   ;;  %vm1316_vm5 = vcmask 1041409   ;;  %vm1319_vm6 = vcmask 1042434  }
  0x76   :  { %2047 = vmatprep.subr.bf16.mxu1 %v2227_v6  ;;  %v300_v25 = vsub.s32 0, %v253_v13  ;;  %vm1322_vm7 = vcmask 1043459   ;;  %vm1325_vm8 = vcmask 1044484   ;;  %vm1328_vm9 = vcmask 1045509  }
  0x77   :  { %v251_v12 = vunpack.c.0.s8 %v250_v10  ;;  %vm1331_vm10 = vcmask 1046534   ;;  %vm1334_vm11 = vcmask 1047559   ;;  %vm1761_vm12 = vcmask 523264  }
  0x78   :  { %2040 = vmatpush3.bf16.msra.mxu0 %v2225_v2 }
  0x79   :  { %2053 = vmatprep.subr.bf16.mxu0 %v2506_v0  ;;  %2048 = vmatpush3.bf16.msra.mxu1 %v2227_v6  ;;  %v2657_v7 = vld [vmem:[%s2958_s26] sm:$0xf]  ;;  %v254_v15 = vsub.s32 %v251_v12, %v253_v13  ;;  %v2675_v58 = vld [vmem:[%s2958_s26 + $0x4] sm:$0xf]  ;;  %v2683_v61 = vld [vmem:[%s2958_s26 + $0x8] sm:$0xf] }
  0x7a   :  { %2059 = vmatprep.subr.bf16.mxu1 %v2506_v0  ;;  %v459_v8 = vsel %vm203_vm1, %v2657_v7, 0  ;;  %v505_v59 = vsel %vm203_vm1, %v2675_v58, 0  ;;  %v2688_v63 = vld [vmem:[%s2958_s26 + $0xc] sm:$0xf]  ;;  %v551_v3 = vsel %vm203_vm1, %v2683_v61, 0 }
  0x7b   :  { %2042 = vmatmul.mubr.msk.bf16.vlgmr.msra.gmra.mxu0 %vm203_vm1, %v179_v4  ;;  %v597_v6 = vsel %vm203_vm1, %v2688_v63, 0  ;;  %v2704_v9 = vld [vmem:[%s2958_s26 + $0x10] sm:$0xf]  ;;  %v2710_v11 = vld [vmem:[%s2958_s26 + $0x14] sm:$0xf] }
  0x7c   :  { %2055 = vmatprep.mubr.msk.bf16.mxu0 %vm2507_vm0, %v2506_v0  ;;  %2054 = vmatpush3.bf16.xpose.msra.mxu0 %v459_v8  ;;  %v643_v13 = vsel %vm203_vm1, %v2704_v9, 0 }
  0x7d   :  { %2065 = vmatprep.subr.bf16.mxu0 %v2506_v0 }
 0x13b   :  { %v241_v16 = vpop.f32.mrf.mxu0 }
 0x13c   :  { %v242_v17 = vadd.f32 %v1921_v14, %v241_v16  ;;  %v2726_v16 = vld [vmem:[%s2958_s26 + $0x18] sm:$0xf] }
 0x13d   :  { %v2043_v18 = vpop.f32.mrf.mxu0 }
 0x13e   :  { %v248_v19 = vcombine.high %v242_v17, %v242_v17  ;;  %v255_v20 = vrot.slane %v242_v17, %v254_v15  ;;  %v2732_v18 = vld [vmem:[%s2958_s26 + $0x1c] sm:$0xf] }
 0x13f   :  { %v244_v21 = vpop.f32.mrf.mxu0 }
 0x140   :  { %v262_v22 = vrot.slane %v248_v19, %v254_v15  ;;  %v263_v23 = vcombine.high %v255_v20, %v255_v20  ;;  %v271_v24 = vrot.slane %v255_v20, %v254_v15  ;;  %v735_v20 = vsel %vm203_vm1, %v2726_v16, 0 }
 0x141   :  { %v2044_v26 = vpop.f32.mrf.mxu0 }
 0x142   :  { %v264_v27 = vcombine.high %v262_v22, %v262_v22  ;;  %v278_v28 = vrot.slane %v262_v22, %v254_v15  ;;  %v285_v29 = vrot.slane %v263_v23, %v254_v15  ;;  %v293_v30 = vcombine.high %v271_v24, %v271_v24 }
 0x143   :  { %v301_v34 = vrot.slane %v271_v24, %v300_v25  ;;  %v781_v22 = vsel %vm203_vm1, %v2732_v18, 0 }
 0x144   :  { %v292_v31 = vrot.slane %v264_v27, %v254_v15  ;;  %v294_v32 = vcombine.high %v278_v28, %v278_v28  ;;  %v295_v33 = vcombine.high %v285_v29, %v285_v29  ;;  %v305_v35 = vrot.slane %v285_v29, %v300_v25 }
 0x145   :  { %v309_v36 = vrot.slane %v293_v30, %v300_v25  ;;  %v317_v39 = vrot.slane %v278_v28, %v300_v25  ;;  %v338_v46 = vmul.f32 %v301_v34, %v297_v38  ;;  %v689_v15 = vsel %vm203_vm1, %v2710_v11, 0 }
 0x146   :  { %v296_v37 = vcombine.high %v292_v31, %v292_v31  ;;  %v321_v40 = vrot.slane %v292_v31, %v300_v25  ;;  %v325_v41 = vrot.slane %v294_v32, %v300_v25  ;;  %v313_v42 = vrot.slane %v295_v33, %v300_v25 }
 0x147   :  { %v339_v43 = vmul.f32 %v305_v35, %v297_v38  ;;  %v340_v47 = vmul.f32 %v309_v36, %v297_v38  ;;  %v342_v49 = vmul.f32 %v317_v39, %v297_v38 }
 0x148   :  { %v329_v44 = vrot.slane %v296_v37, %v300_v25  ;;  %v343_v45 = vmul.f32 %v321_v40, %v297_v38  ;;  %v341_v48 = vmul.f32 %v313_v42, %v297_v38  ;;  %v344_v50 = vmul.f32 %v325_v41, %v297_v38 }
 0x149   :  { %v354_v52 = vcombine.low %v338_v46, %v339_v43 }
 0x14a   :  { %v345_v51 = vmul.f32 %v329_v44, %v297_v38  ;;  %v355_v53 = vcombine.low %v340_v47, %v341_v48  ;;  %v356_v54 = vcombine.low %v342_v49, %v343_v45 }
 0x14c   :  { %v357_v55 = vcombine.low %v344_v50, %v345_v51  ;;  %v362_v56 = vpack.c.bf16 %v355_v53, %v354_v52 }
 0x14e   :  { %v363_v57 = vpack.c.bf16 %v357_v55, %v356_v54  ;;  %2049 = vmatprep.mubr.msk.bf16.mxu1 %vm203_vm1, %v362_v56 }
 0x150   :  { %2050 = vmatmul.mubr.msk.bf16.vlgmr.msra.gmra.mxu1 %vm203_vm1, %v363_v57 }
 0x151   :  { %2061 = vmatprep.mubr.msk.bf16.mxu1 %vm2507_vm0, %v2506_v0  ;;  %2060 = vmatpush3.bf16.xpose.msra.mxu1 %v505_v59 }
 0x152   :  { %2071 = vmatprep.subr.bf16.mxu1 %v2506_v0 }
 0x210   :  { %v2051_v60 = vpop.f32.mrf.mxu1 }
 0x211   :  { %v441_v17 = vcombine.high %v2051_v60, %v2051_v60  ;;  %v451_v19 = vpack.c.bf16 %v2051_v60, %v2051_v60 }
 0x212   :  { %v420_v62 = vpop.f32.mrf.mxu1 }
 0x213   :  { %v439_v1 = vcombine.high %v420_v62, %v420_v62  ;;  %v447_v2 = vpack.c.bf16 %v420_v62, %v420_v62  ;;  %v452_v21 = vpack.c.bf16 %v441_v17, %v441_v17 }
 0x214   :  { %v2052_v4 = vpop.f32.mrf.mxu1 }
 0x215   :  { %v448_v5 = vpack.c.bf16 %v439_v1, %v439_v1  ;;  %2056 = vmatmul.mubr.msk.bf16.vlgmr.msra.gmra.mxu0 %vm203_vm1, %v447_v2  ;;  %v442_v23 = vcombine.high %v2052_v4, %v2052_v4  ;;  %v453_v24 = vpack.c.bf16 %v2052_v4, %v2052_v4 }
 0x216   :  { %2066 = vmatpush3.bf16.xpose.msra.mxu0 %v551_v3  ;;  %v423_v8 = vpop.f32.mrf.mxu1  ;;  %2067 = vmatprep.mubr.msk.bf16.mxu0 %vm2507_vm0, %v2506_v0 }
 0x217   :  { %2062 = vmatmul.mubr.msk.bf16.vlgmr.msra.gmra.mxu1 %vm203_vm1, %v448_v5  ;;  %2077 = vmatprep.subr.bf16.mxu0 %v2506_v0  ;;  %v440_v10 = vcombine.high %v423_v8, %v423_v8  ;;  %v449_v12 = vpack.c.bf16 %v423_v8, %v423_v8  ;;  %v454_v25 = vpack.c.bf16 %v442_v23, %v442_v23 }
 0x218   :  { %2072 = vmatpush3.bf16.xpose.msra.mxu1 %v597_v6  ;;  %2073 = vmatprep.mubr.msk.bf16.mxu1 %vm2507_vm0, %v2506_v0 }
 0x219   :  { %2083 = vmatprep.subr.bf16.mxu1 %v2506_v0  ;;  %v450_v14 = vpack.c.bf16 %v440_v10, %v440_v10 }
 0x21d   :  { %2068 = vmatmul.mubr.msk.bf16.vlgmr.msra.gmra.mxu0 %vm203_vm1, %v449_v12 }
 0x21e   :  { %2078 = vmatpush3.bf16.xpose.msra.mxu0 %v643_v13  ;;  %2079 = vmatprep.mubr.msk.bf16.mxu0 %vm2507_vm0, %v2506_v0 }
 0x21f   :  { %2074 = vmatmul.mubr.msk.bf16.vlgmr.msra.gmra.mxu1 %vm203_vm1, %v450_v14  ;;  %2089 = vmatprep.subr.bf16.mxu0 %v2506_v0 }
 0x220   :  { %2084 = vmatpush3.bf16.xpose.msra.mxu1 %v689_v15  ;;  %2085 = vmatprep.mubr.msk.bf16.mxu1 %vm2507_vm0, %v2506_v0 }
 0x221   :  { %2095 = vmatprep.subr.bf16.mxu1 %v2506_v0 }
 0x225   :  { %2080 = vmatmul.mubr.msk.bf16.vlgmr.msra.gmra.mxu0 %vm203_vm1, %v451_v19 }
 0x226   :  { %2090 = vmatpush3.bf16.xpose.msra.mxu0 %v735_v20  ;;  %2091 = vmatprep.mubr.msk.bf16.mxu0 %vm2507_vm0, %v2506_v0 }
 0x227   :  { %2086 = vmatmul.mubr.msk.bf16.vlgmr.msra.gmra.mxu1 %vm203_vm1, %v452_v21  ;;  %2101 = vmatprep.subr.bf16.mxu0 %v2506_v0 }
 0x228   :  { %2096 = vmatpush3.bf16.xpose.msra.mxu1 %v781_v22  ;;  %2097 = vmatprep.mubr.msk.bf16.mxu1 %vm2507_vm0, %v2506_v0 }
 0x229   :  { %2107 = vmatprep.subr.bf16.mxu1 %v2506_v0 }
 0x22d   :  { %2092 = vmatmul.mubr.msk.bf16.vlgmr.msra.gmra.mxu0 %vm203_vm1, %v453_v24 }
 0x22e   :  { %2103 = vmatprep.mubr.msk.bf16.mxu0 %vm2507_vm0, %v2506_v0 }
 0x22f   :  { %2098 = vmatmul.mubr.msk.bf16.vlgmr.msra.gmra.mxu1 %vm203_vm1, %v454_v25 }
 0x230   :  { %2109 = vmatprep.mubr.msk.bf16.mxu1 %vm2507_vm0, %v2506_v0 }
 0x2d5   :  { %v495_v26 = vpop.f32.mrf.mxu0 }
 0x2d6   :  { %v824_v27 = vsel %vm823_vm2, %v495_v26, -inf }
 0x2d7   :  { %v541_v28 = vpop.f32.mrf.mxu1  ;;  %825 = vmax.xlane.f32.xlu0 %v824_v27  ;;  %v2057_v29 = vpop.f32.mrf.mxu0 }
 0x2d8   :  { %v827_v32 = vsel %vm823_vm2, %v541_v28, -inf }
 0x2d9   :  { %v498_v30 = vpop.f32.mrf.mxu0  ;;  %v2063_v31 = vpop.f32.mrf.mxu1 }
 0x2db   :  { %v544_v33 = vpop.f32.mrf.mxu1  ;;  %828 = vmax.xlane.f32.xlu0 %v827_v32  ;;  %v2058_v34 = vpop.f32.mrf.mxu0 }
 0x2dd   :  { %v2064_v35 = vpop.f32.mrf.mxu1  ;;  %v587_v36 = vpop.f32.mrf.mxu0 }
 0x2de   :  { %v830_v37 = vsel %vm823_vm2, %v587_v36, -inf }
 0x2df   :  { %v633_v38 = vpop.f32.mrf.mxu1  ;;  %831 = vmax.xlane.f32.xlu1 %v830_v37  ;;  %v2069_v39 = vpop.f32.mrf.mxu0 }
 0x2e0   :  { %v833_v42 = vsel %vm823_vm2, %v633_v38, -inf }
 0x2e1   :  { %v590_v40 = vpop.f32.mrf.mxu0  ;;  %v2075_v41 = vpop.f32.mrf.mxu1 }
 0x2e3   :  { %v636_v43 = vpop.f32.mrf.mxu1  ;;  %834 = vmax.xlane.f32.xlu1 %v833_v42  ;;  %v2070_v44 = vpop.f32.mrf.mxu0 }
 0x2e5   :  { %v2076_v45 = vpop.f32.mrf.mxu1  ;;  %v679_v46 = vpop.f32.mrf.mxu0 }
 0x2e6   :  { %v836_v47 = vsel %vm823_vm2, %v679_v46, -inf }
 0x2e7   :  { %v725_v48 = vpop.f32.mrf.mxu1  ;;  %837 = vmax.xlane.f32.xlu0 %v836_v47  ;;  %v2081_v49 = vpop.f32.mrf.mxu0 }
 0x2e8   :  { %v839_v50 = vsel %vm823_vm2, %v725_v48, -inf  ;;  %v925_v49 = vsel %vm924_vm3, %v2657_v7, 0 }
 0x2e9   :  { %v2087_v51 = vpop.f32.mrf.mxu1  ;;  %840 = vmax.xlane.f32.xlu1 %v839_v50  ;;  %v682_v52 = vpop.f32.mrf.mxu0  ;;  %v970_v50 = vsel %vm924_vm3, %v2675_v58, 0  ;;  %2102 = vmatpush3.bf16.msra.mxu0 %v925_v49 }
 0x2ea   :  { %2108 = vmatpush3.bf16.msra.mxu1 %v970_v50  ;;  %2113 = vmatprep.subr.bf16.mxu0 %v2506_v0 }
 0x2eb   :  { %v2082_v53 = vpop.f32.mrf.mxu0  ;;  %v728_v54 = vpop.f32.mrf.mxu1  ;;  %2119 = vmatprep.subr.bf16.mxu1 %v2506_v0 }
 0x2ed   :  { %v2088_v55 = vpop.f32.mrf.mxu1  ;;  %v771_v56 = vpop.f32.mrf.mxu0 }
 0x2ee   :  { %v842_v57 = vsel %vm823_vm2, %v771_v56, -inf }
 0x2ef   :  { %v817_v59 = vpop.f32.mrf.mxu1  ;;  %843 = vmax.xlane.f32.xlu0 %v842_v57  ;;  %v2093_v60 = vpop.f32.mrf.mxu0 }
 0x2f0   :  { %v845_v62 = vsel %vm823_vm2, %v817_v59, -inf  ;;  %v1015_v60 = vsel %vm924_vm3, %v2683_v61, 0 }
 0x2f1   :  { %v2099_v1 = vpop.f32.mrf.mxu1  ;;  %846 = vmax.xlane.f32.xlu1 %v845_v62  ;;  %v774_v2 = vpop.f32.mrf.mxu0 }
 0x2f3   :  { %v2094_v3 = vpop.f32.mrf.mxu0  ;;  %v820_v4 = vpop.f32.mrf.mxu1 }
 0x2f4   :  { %v1060_v4 = vsel %vm924_vm3, %v2688_v63, 0 }
 0x2f5   :  { %v2100_v5 = vpop.f32.mrf.mxu1 }
 0x360   :  { %v826_v6 = vpop.xlane.xlu0 %825 }
 0x361   :  { %v848_v8 = vsub.f32 %v495_v26, %v826_v6 }
 0x363   :  { %v856_v10 = vmul.f32 1.442695, %v848_v8 }
 0x364   :  { %v829_v12 = vpop.xlane.xlu0 %828 }
 0x365   :  { %2244 = vpow2.f32 %v856_v10  ;;  %v849_v13 = vsub.f32 %v541_v28, %v829_v12  ;;  %v1105_v10 = vsel %vm924_vm3, %v2704_v9, 0 }
 0x367   :  { %v858_v14 = vmul.f32 1.442695, %v849_v13 }
 0x368   :  { %v832_v15 = vpop.xlane.xlu1 %831 }
 0x369   :  { %2246 = vpow2.f32 %v858_v14  ;;  %v850_v17 = vsub.f32 %v587_v36, %v832_v15  ;;  %v1150_v15 = vsel %vm924_vm3, %v2710_v11, 0 }
 0x36b   :  { %v860_v19 = vmul.f32 1.442695, %v850_v17 }
 0x36c   :  { %v835_v20 = vpop.xlane.xlu1 %834 }
 0x36d   :  { %2248 = vpow2.f32 %v860_v19  ;;  %v851_v21 = vsub.f32 %v633_v38, %v835_v20 }
 0x36f   :  { %v862_v22 = vmul.f32 1.442695, %v851_v21  ;;  %v1195_v21 = vsel %vm924_vm3, %v2726_v16, 0 }
 0x370   :  { %v838_v23 = vpop.xlane.xlu0 %837 }
 0x371   :  { %2250 = vpow2.f32 %v862_v22  ;;  %v852_v24 = vsub.f32 %v679_v46, %v838_v23  ;;  %v1240_v23 = vsel %vm924_vm3, %v2732_v18, 0 }
 0x372   :  { %v2245_v25 = vpop.eup %2244  ;;  %v841_v27 = vpop.xlane.xlu1 %840 }
 0x373   :  { %v864_v29 = vmul.f32 1.442695, %v852_v24  ;;  %v853_v26 = vsub.f32 %v725_v48, %v841_v27  ;;  %v872_v30 = vsel %vm823_vm2, %v2245_v25, 0.0 }
 0x374   :  { %873 = vadd.xlane.f32.xlu0 %v872_v30  ;;  %v2229_v30 = vld [vmem:[#allocation7 + $0x8] sm:$0xff]  }
 0x375   :  { %2252 = vpow2.f32 %v864_v29  ;;  %v866_v28 = vmul.f32 1.442695, %v853_v26  ;;  %v2228_v26 = vld [vmem:[#allocation7 + $0x18] sm:$0xff]  }
 0x376   :  { %v2247_v31 = vpop.eup %2246 }
 0x377   :  { %2254 = vpow2.f32 %v866_v28  ;;  %v875_v32 = vsel %vm823_vm2, %v2247_v31, 0.0  ;;  %v2230_v28 = vld [vmem:[#allocation7 + $0x10] sm:$0xff]  }
 0x378   :  { %876 = vadd.xlane.f32.xlu1 %v875_v32  ;;  %v844_v33 = vpop.xlane.xlu0 %843 }
 0x379   :  { %v854_v34 = vsub.f32 %v771_v56, %v844_v33 }
 0x37a   :  { %v2249_v35 = vpop.eup %2248  ;;  %v847_v36 = vpop.xlane.xlu1 %846 }
 0x37b   :  { %v868_v37 = vmul.f32 1.442695, %v854_v34  ;;  %v855_v38 = vsub.f32 %v817_v59, %v847_v36  ;;  %v878_v39 = vsel %vm823_vm2, %v2249_v35, 0.0 }
 0x37c   :  { %879 = vadd.xlane.f32.xlu0 %v878_v39 }
 0x37d   :  { %2256 = vpow2.f32 %v868_v37  ;;  %v870_v40 = vmul.f32 1.442695, %v855_v38 }
 0x37e   :  { %v2251_v41 = vpop.eup %2250 }
 0x37f   :  { %2258 = vpow2.f32 %v870_v40  ;;  %v881_v42 = vsel %vm823_vm2, %v2251_v41, 0.0 }
 0x380   :  { %882 = vadd.xlane.f32.xlu1 %v881_v42 }
 0x382   :  { %v2764_v43 = vpop.eup %2252 }
 0x383   :  { %v884_v44 = vsel %vm823_vm2, %v2764_v43, 0.0 }
 0x384   :  { %v2768_v45 = vpop.eup %2254  ;;  %885 = vadd.xlane.f32.xlu0 %v884_v44 }
 0x385   :  { %v887_v46 = vsel %vm823_vm2, %v2768_v45, 0.0 }
 0x386   :  { %888 = vadd.xlane.f32.xlu1 %v887_v46 }
 0x38a   :  { %v2772_v47 = vpop.eup %2256 }
 0x38b   :  { %v890_v48 = vsel %vm823_vm2, %v2772_v47, 0.0 }
 0x38c   :  { %v2780_v51 = vpop.eup %2258  ;;  %891 = vadd.xlane.f32.xlu0 %v890_v48 }
 0x38d   :  { %v893_v52 = vsel %vm823_vm2, %v2780_v51, 0.0 }
 0x38e   :  { %894 = vadd.xlane.f32.xlu1 %v893_v52 }
 0x3fd   :  { %v874_v53 = vpop.xlane.xlu0 %873 }
 0x3fe   :  { %2260 = vrcp.f32 %v874_v53 }
 0x401   :  { %v877_v54 = vpop.xlane.xlu1 %876 }
 0x402   :  { %2262 = vrcp.f32 %v877_v54 }
 0x405   :  { %v880_v7 = vpop.xlane.xlu0 %879 }
 0x406   :  { %2264 = vrcp.f32 %v880_v7 }
 0x409   :  { %v883_v58 = vpop.xlane.xlu1 %882 }
 0x40a   :  { %2266 = vrcp.f32 %v883_v58 }
 0x40b   :  { %v2261_v55 = vpop.eup %2260 }
 0x40c   :  { %v904_v56 = vmul.f32 %v2261_v55, %v2245_v25 }
 0x40d   :  { %v886_v57 = vpop.xlane.xlu0 %885 }
 0x40e   :  { %2268 = vrcp.f32 %v886_v57  ;;  %v912_v59 = vpack.c.bf16 %v904_v56, %v904_v56 }
 0x40f   :  { %v2263_v62 = vpop.eup %2262  ;;  %v889_v1 = vpop.xlane.xlu1 %888 }
 0x410   :  { %2270 = vrcp.f32 %v889_v1  ;;  %2104 = vmatmul.mubr.msk.bf16.vlgmr.msra.gmra.mxu0 %vm920_vm4, %v912_v59  ;;  %v905_v2 = vmul.f32 %v2263_v62, %v2247_v31  ;;  %v2231_v31 = vld [vmem:[#allocation7] sm:$0xff]  }
 0x411   :  { %2114 = vmatpush3.bf16.msra.mxu0 %v1015_v60  ;;  %2115 = vmatprep.mubr.msk.bf16.mxu0 %vm2507_vm0, %v2506_v0 }
 0x412   :  { %v913_v3 = vpack.c.bf16 %v905_v2, %v905_v2  ;;  %2125 = vmatprep.subr.bf16.mxu0 %v2506_v0 }
 0x413   :  { %v2265_v5 = vpop.eup %2264 }
 0x414   :  { %2110 = vmatmul.mubr.msk.bf16.vlgmr.msra.gmra.mxu1 %vm920_vm4, %v913_v3  ;;  %v906_v61 = vmul.f32 %v2265_v5, %v2249_v35 }
 0x415   :  { %2120 = vmatpush3.bf16.msra.mxu1 %v1060_v4  ;;  %v892_v6 = vpop.xlane.xlu0 %891  ;;  %2121 = vmatprep.mubr.msk.bf16.mxu1 %vm2507_vm0, %v2506_v0 }
 0x416   :  { %2272 = vrcp.f32 %v892_v6  ;;  %v914_v8 = vpack.c.bf16 %v906_v61, %v906_v61  ;;  %2131 = vmatprep.subr.bf16.mxu1 %v2506_v0 }
 0x417   :  { %v2267_v12 = vpop.eup %2266  ;;  %v895_v63 = vpop.xlane.xlu1 %894 }
 0x418   :  { %2274 = vrcp.f32 %v895_v63  ;;  %2116 = vmatmul.mubr.msk.bf16.vlgmr.msra.gmra.mxu0 %vm920_vm4, %v914_v8  ;;  %v907_v13 = vmul.f32 %v2267_v12, %v2251_v41 }
 0x419   :  { %2126 = vmatpush3.bf16.msra.mxu0 %v1105_v10  ;;  %2127 = vmatprep.mubr.msk.bf16.mxu0 %vm2507_vm0, %v2506_v0 }
 0x41a   :  { %v915_v14 = vpack.c.bf16 %v907_v13, %v907_v13  ;;  %2137 = vmatprep.subr.bf16.mxu0 %v2506_v0 }
 0x41b   :  { %v2269_v17 = vpop.eup %2268 }
 0x41c   :  { %2122 = vmatmul.mubr.msk.bf16.vlgmr.msra.gmra.mxu1 %vm920_vm4, %v915_v14  ;;  %v908_v9 = vmul.f32 %v2269_v17, %v2764_v43 }
 0x41d   :  { %v2271_v19 = vpop.eup %2270  ;;  %2132 = vmatpush3.bf16.msra.mxu1 %v1150_v15  ;;  %2133 = vmatprep.mubr.msk.bf16.mxu1 %vm2507_vm0, %v2506_v0 }
 0x41e   :  { %v916_v20 = vpack.c.bf16 %v908_v9, %v908_v9  ;;  %2143 = vmatprep.subr.bf16.mxu1 %v2506_v0  ;;  %v909_v11 = vmul.f32 %v2271_v19, %v2768_v45 }
 0x420   :  { %2128 = vmatmul.mubr.msk.bf16.vlgmr.msra.gmra.mxu0 %vm920_vm4, %v916_v20  ;;  %v917_v22 = vpack.c.bf16 %v909_v11, %v909_v11 }
 0x421   :  { %2138 = vmatpush3.bf16.msra.mxu0 %v1195_v21  ;;  %2139 = vmatprep.mubr.msk.bf16.mxu0 %vm2507_vm0, %v2506_v0 }
 0x422   :  { %2149 = vmatprep.subr.bf16.mxu0 %v2506_v0 }
 0x423   :  { %v2273_v24 = vpop.eup %2272 }
 0x424   :  { %2134 = vmatmul.mubr.msk.bf16.vlgmr.msra.gmra.mxu1 %vm920_vm4, %v917_v22  ;;  %v910_v16 = vmul.f32 %v2273_v24, %v2772_v47 }
 0x425   :  { %v2275_v25 = vpop.eup %2274  ;;  %2144 = vmatpush3.bf16.msra.mxu1 %v1240_v23  ;;  %2145 = vmatprep.mubr.msk.bf16.mxu1 %vm2507_vm0, %v2506_v0 }
 0x426   :  { %v918_v27 = vpack.c.bf16 %v910_v16, %v910_v16  ;;  %v911_v29 = vmul.f32 %v2275_v25, %v2780_v51  ;;  %2157 = vmatprep.subr.bf16.mxu1 %v2506_v0 }
 0x428   :  { %2140 = vmatmul.mubr.msk.bf16.vlgmr.msra.gmra.mxu0 %vm920_vm4, %v918_v27  ;;  %v919_v18 = vpack.c.bf16 %v911_v29, %v911_v29 }
 0x429   :  { %2153 = vmatprep.mubr.msk.bf16.mxu0 %vm2507_vm0, %v2506_v0  ;;  %2150 = vmatpush3.bf16.msra.mxu0 %v2228_v26 }
 0x42a   :  { %2151 = vmatprep.subr.bf16.mxu0 %v2506_v0 }
 0x42c   :  { %2146 = vmatmul.mubr.msk.bf16.vlgmr.msra.gmra.mxu1 %vm920_vm4, %v919_v18 }
 0x42d   :  { %2161 = vmatprep.mubr.msk.bf16.mxu1 %vm2507_vm0, %v2506_v0  ;;  %2158 = vmatpush3.bf16.msra.mxu1 %v2229_v30 }
 0x42e   :  { %2159 = vmatprep.subr.bf16.mxu1 %v2506_v0  ;;  %2152 = vmatpush3.bf16.msra.mxu0 %v2230_v28 }
 0x42f   :  { %2165 = vmatprep.subr.bf16.mxu0 %v2506_v0 }
 0x431   :  { %2160 = vmatpush3.bf16.msra.mxu1 %v2231_v31 }
 0x432   :  { %2173 = vmatprep.subr.bf16.mxu1 %v2506_v0 }
 0x4d0   :  { %v961_v32 = vpop.f32.mrf.mxu0 }
 0x4d1   :  { %v1282_v47 = vpack.c.bf16 %v961_v32, %v961_v32 }
 0x4d2   :  { %v2105_v33 = vpop.f32.mrf.mxu0 }
 0x4d3   :  { %v1307_v7 = vunpack.c.l.b16 %v1282_v47 }
 0x4d4   :  { %v964_v34 = vpop.f32.mrf.mxu0  ;;  %v1006_v35 = vpop.f32.mrf.mxu1 }
 0x4d5   :  { %v1283_v46 = vpack.c.bf16 %v1006_v35, %v1006_v35  ;;  %v1315_v4 = vrot.slane %v1307_v7, 1  ;;  %v1467_v8 = vrot.slane %v1307_v7, 2  ;;  %v1543_v10 = vrot.slane %v1307_v7, 3 }
 0x4d6   :  { %v2106_v36 = vpop.f32.mrf.mxu0  ;;  %v2111_v37 = vpop.f32.mrf.mxu1 }
 0x4d7   :  { %v1308_v53 = vunpack.c.l.b16 %v1283_v46 }
 0x4d8   :  { %v1009_v38 = vpop.f32.mrf.mxu1  ;;  %v1051_v39 = vpop.f32.mrf.mxu0 }
 0x4d9   :  { %v1284_v50 = vpack.c.bf16 %v1051_v39, %v1051_v39  ;;  %v1392_v1 = vrot.slane %v1308_v53, 7  ;;  %v1468_v2 = vrot.slane %v1308_v53, 1  ;;  %v1544_v12 = vrot.slane %v1308_v53, 2 }
 0x4da   :  { %v2112_v40 = vpop.f32.mrf.mxu1  ;;  %v2117_v41 = vpop.f32.mrf.mxu0  ;;  %v1317_v13 = vsel %vm1316_vm5, %v1308_v53, %v1315_v4 }
 0x4db   :  { %v1309_v59 = vunpack.c.l.b16 %v1284_v50  ;;  %v1393_v20 = vsel %vm1316_vm5, %v1392_v1, %v1307_v7  ;;  %v1469_v21 = vsel %vm1316_vm5, %v1468_v2, %v1467_v8  ;;  %v1545_v18 = vsel %vm1316_vm5, %v1544_v12, %v1543_v10 }
 0x4dc   :  { %v1054_v42 = vpop.f32.mrf.mxu0  ;;  %v1096_v43 = vpop.f32.mrf.mxu1 }
 0x4dd   :  { %v1285_v54 = vpack.c.bf16 %v1096_v43, %v1096_v43  ;;  %v1318_v14 = vrot.slane %v1309_v59, 7  ;;  %v1394_v15 = vrot.slane %v1309_v59, 6  ;;  %v1546_v23 = vrot.slane %v1309_v59, 1 }
 0x4de   :  { %v2118_v44 = vpop.f32.mrf.mxu0  ;;  %v2123_v45 = vpop.f32.mrf.mxu1  ;;  %v1470_v37 = vsel %vm1319_vm6, %v1309_v59, %v1469_v21  ;;  %v2233_v59 = vld [vmem:[#allocation7 + $0x38] sm:$0xff]  }
 0x4df   :  { %v2836_v3 = vunpack.c.l.b16 %v1285_v54  ;;  %v1320_v31 = vsel %vm1319_vm6, %v1318_v14, %v1317_v13  ;;  %v1395_v32 = vsel %vm1319_vm6, %v1394_v15, %v1393_v20  ;;  %v1547_v42 = vsel %vm1319_vm6, %v1546_v23, %v1545_v18  ;;  %v2234_v13 = vld [vmem:[#allocation7 + $0x20] sm:$0xff]   ;;  %v2235_v14 = vld [vmem:[#allocation7 + $0x30] sm:$0xff]  }
 0x4e0   :  { %v1099_v48 = vpop.f32.mrf.mxu1  ;;  %v1141_v49 = vpop.f32.mrf.mxu0 }
 0x4e1   :  { %v1286_v58 = vpack.c.bf16 %v1141_v49, %v1141_v49  ;;  %v1321_v11 = vrot.slane %v2836_v3, 6  ;;  %v1396_v22 = vrot.slane %v2836_v3, 5  ;;  %v1471_v41 = vrot.slane %v2836_v3, 7 }
 0x4e2   :  { %v2124_v51 = vpop.f32.mrf.mxu1  ;;  %v2129_v52 = vpop.f32.mrf.mxu0 }
 0x4e3   :  { %v2838_v5 = vunpack.c.l.b16 %v1286_v58  ;;  %v1323_v38 = vsel %vm1322_vm7, %v1321_v11, %v1320_v31  ;;  %v1397_v39 = vsel %vm1322_vm7, %v1396_v22, %v1395_v32  ;;  %v1472_v4 = vsel %vm1322_vm7, %v1471_v41, %v1470_v37 }
 0x4e4   :  { %v1144_v55 = vpop.f32.mrf.mxu0  ;;  %v1186_v56 = vpop.f32.mrf.mxu1 }
 0x4e5   :  { %v1287_v57 = vpack.c.bf16 %v1186_v56, %v1186_v56  ;;  %v1324_v24 = vrot.slane %v2838_v5, 5  ;;  %v1398_v16 = vrot.slane %v2838_v5, 4  ;;  %v1473_v50 = vrot.slane %v2838_v5, 6 }
 0x4e6   :  { %v2130_v60 = vpop.f32.mrf.mxu0  ;;  %v2135_v62 = vpop.f32.mrf.mxu1  ;;  %v1549_v51 = vrot.slane %v2838_v5, 7  ;;  %v1548_v5 = vsel %vm1322_vm7, %v2836_v3, %v1547_v42 }
 0x4e7   :  { %v2840_v63 = vunpack.c.l.b16 %v1287_v57  ;;  %v1326_v43 = vsel %vm1325_vm8, %v1324_v24, %v1323_v38  ;;  %v1399_v44 = vsel %vm1325_vm8, %v1398_v16, %v1397_v39  ;;  %v2232_v57 = vld [vmem:[#allocation7 + $0x28] sm:$0xff]   ;;  %v1474_v8 = vsel %vm1325_vm8, %v1473_v50, %v1472_v4  ;;  %v2239_v50 = vld [vmem:[%s2948_s12 + $0x10] sm:$0xff]  }
 0x4e8   :  { %v1189_v61 = vpop.f32.mrf.mxu1  ;;  %v1231_v6 = vpop.f32.mrf.mxu0  ;;  %v1550_v10 = vsel %vm1325_vm8, %v1549_v51, %v1548_v5  ;;  %v2282_v39 = vld [vmem:[#allocation2] sm:$0xff] }
 0x4e9   :  { %v1288_v17 = vpack.c.bf16 %v1231_v6, %v1231_v6  ;;  %v1327_v26 = vrot.slane %v2840_v63, 4  ;;  %v1400_v30 = vrot.slane %v2840_v63, 3  ;;  %v1475_v7 = vrot.slane %v2840_v63, 5 }
 0x4ea   :  { %v2136_v9 = vpop.f32.mrf.mxu1  ;;  %v2141_v19 = vpop.f32.mrf.mxu0  ;;  %v1551_v58 = vrot.slane %v2840_v63, 6 }
 0x4eb   :  { %v1313_v25 = vunpack.c.l.b16 %v1288_v17  ;;  %v1329_v46 = vsel %vm1328_vm9, %v1327_v26, %v1326_v43  ;;  %v1401_v47 = vsel %vm1328_vm9, %v1400_v30, %v1399_v44  ;;  %v1476_v12 = vsel %vm1328_vm9, %v1475_v7, %v1474_v8  ;;  %v1958_v7 = vld [vmem:[#allocation10] ss:$0 sm:$0xff] }
 0x4ec   :  { %v1234_v27 = vpop.f32.mrf.mxu0  ;;  %v1276_v29 = vpop.f32.mrf.mxu1  ;;  %v1552_v63 = vsel %vm1328_vm9, %v1551_v58, %v1550_v10 }
 0x4ed   :  { %v1289_v28 = vpack.c.bf16 %v1276_v29, %v1276_v29  ;;  %v1330_v33 = vrot.slane %v1313_v25, 3  ;;  %v1402_v34 = vrot.slane %v1313_v25, 2  ;;  %v1477_v60 = vrot.slane %v1313_v25, 4 }
 0x4ee   :  { %v2142_v35 = vpop.f32.mrf.mxu0  ;;  %v2147_v36 = vpop.f32.mrf.mxu1  ;;  %v1553_v62 = vrot.slane %v1313_v25, 5 }
 0x4ef   :  { %v1314_v40 = vunpack.c.l.b16 %v1289_v28  ;;  %v1332_v52 = vsel %vm1331_vm10, %v1330_v33, %v1329_v46  ;;  %v1403_v53 = vsel %vm1331_vm10, %v1402_v34, %v1401_v47  ;;  %v1478_v3 = vsel %vm1331_vm10, %v1477_v60, %v1476_v12  ;;  %v1957_v28 = vld [vmem:[#allocation8] ss:$0 sm:$0xff]  ;;  %v2236_v47 = vld [vmem:[#allocation13 + $0x8] sm:$0xff]   ;;  %v1964_v12 = vld [vmem:[%s2949_s13] ss:$0 sm:$0xff] }
 0x4f0   :  { %v1279_v45 = vpop.f32.mrf.mxu1  ;;  %v1554_v15 = vsel %vm1331_vm10, %v1553_v62, %v1552_v63  ;;  %v2240_v60 = vld [vmem:[%s2948_s12 + $0x8] sm:$0xff]   ;;  %v2241_v62 = vld [vmem:[%s2948_s12] sm:$0xff]  }
 0x4f1   :  { %v1333_v48 = vrot.slane %v1314_v40, 2  ;;  %v1404_v49 = vrot.slane %v1314_v40, 1  ;;  %v1479_v61 = vrot.slane %v1314_v40, 3  ;;  %v1555_v6 = vrot.slane %v1314_v40, 4 }
 0x4f2   :  { %v2148_v54 = vpop.f32.mrf.mxu1 }
 0x4f3   :  { %v1335_v55 = vsel %vm1334_vm11, %v1333_v48, %v1332_v52  ;;  %v1405_v56 = vsel %vm1334_vm11, %v1404_v49, %v1403_v53  ;;  %v1480_v17 = vsel %vm1334_vm11, %v1479_v61, %v1478_v3  ;;  %v1556_v9 = vsel %vm1334_vm11, %v1555_v6, %v1554_v15  ;;  %v2237_v48 = vld [vmem:[#allocation13] sm:$0xff]  }
 0x4f4   :  { %v1336_v1 = vpack.c.b16 %v1335_v55, %v1335_v55  ;;  %v1406_v2 = vpack.c.b16 %v1405_v56, %v1405_v56  ;;  %v1481_v19 = vpack.c.b16 %v1480_v17, %v1480_v17  ;;  %v1557_v20 = vpack.c.b16 %v1556_v9, %v1556_v9  ;;  %v2238_v49 = vld [vmem:[%s2948_s12 + $0x18] sm:$0xff]  }
 0x4f5   :  { %v1959_v55 = vld [vmem:[#allocation11] ss:$0 sm:$0xff] }
 0x4f6   :  { %2154 = vmatmul.mubr.msk.bf16.vlgmr.msra.gmra.mxu0 %vm203_vm1, %v1336_v1  ;;  %2162 = vmatmul.mubr.msk.bf16.vlgmr.msra.gmra.mxu1 %vm203_vm1, %v1406_v2  ;;  %v1960_v1 = vld [vmem:[#allocation14] ss:$0 sm:$0xff] }
 0x4f7   :  { %2166 = vmatpush3.bf16.msra.mxu0 %v2232_v57  ;;  %2174 = vmatpush3.bf16.msra.mxu1 %v2233_v59 }
 0x4f8   :  { %2167 = vmatprep.subr.bf16.mxu0 %v2506_v0  ;;  %2175 = vmatprep.subr.bf16.mxu1 %v2506_v0 }
 0x4f9   :  { %2169 = vmatprep.mubr.msk.bf16.mxu0 %vm2507_vm0, %v2506_v0  ;;  %2177 = vmatprep.mubr.msk.bf16.mxu1 %vm2507_vm0, %v2506_v0 }
 0x4fb   :  { %2168 = vmatpush3.bf16.msra.mxu0 %v2234_v13  ;;  %2176 = vmatpush3.bf16.msra.mxu1 %v2235_v14 }
 0x4fc   :  { %2181 = vmatprep.subr.bf16.mxu0 %v2506_v0  ;;  %2189 = vmatprep.subr.bf16.mxu1 %v2506_v0 }
 0x4fe   :  { %2170 = vmatmul.mubr.msk.bf16.vlgmr.msra.gmra.mxu0 %vm203_vm1, %v1481_v19  ;;  %2178 = vmatmul.mubr.msk.bf16.vlgmr.msra.gmra.mxu1 %vm203_vm1, %v1557_v20 }
 0x4ff   :  { %2185 = vmatprep.mubr.msk.bf16.mxu0 %vm2507_vm0, %v2506_v0  ;;  %2197 = vmatprep.mubr.msk.bf16.mxu1 %vm2507_vm0, %v2506_v0 }
 0x500   :  { %2182 = vmatpush3.bf16.msra.mxu0 %v2236_v47  ;;  %2190 = vmatpush3.bf16.msra.mxu1 %v2238_v49 }
 0x501   :  { %2183 = vmatprep.subr.bf16.mxu0 %v2506_v0  ;;  %2191 = vmatprep.subr.bf16.mxu1 %v2506_v0 }
 0x504   :  { %2184 = vmatpush3.bf16.msra.mxu0 %v2237_v48  ;;  %2192 = vmatpush3.bf16.msra.mxu1 %v2239_v50 }
 0x505   :  { %2201 = vmatprep.subr.bf16.mxu0 %v2506_v0  ;;  %2193 = vmatprep.subr.bf16.mxu1 %v2506_v0 }
 0x508   :  { %2194 = vmatpush3.bf16.msra.mxu1 %v2240_v60 }
 0x509   :  { %2195 = vmatprep.subr.bf16.mxu1 %v2506_v0 }
 0x50c   :  { %2196 = vmatpush3.bf16.msra.mxu1 %v2241_v62 }
 0x5b6   :  { %v1386_v21 = vpop.f32.mrf.mxu0  ;;  %v1456_v11 = vpop.f32.mrf.mxu1 }
 0x5b7   :  { %v1457_v29 = vadd.f32 %v1456_v11, %v1386_v21 }
 0x5b8   :  { %v2155_v22 = vpop.f32.mrf.mxu0  ;;  %v2163_v23 = vpop.f32.mrf.mxu1 }
 0x5b9   :  { %v2242_v23 = vld [vmem:[#allocation16 + $0x8] sm:$0xff]  }
 0x5ba   :  { %v1389_v24 = vpop.f32.mrf.mxu0  ;;  %v1459_v16 = vpop.f32.mrf.mxu1 }
 0x5bb   :  { %v2243_v24 = vld [vmem:[#allocation16] sm:$0xff]  }
 0x5bc   :  { %v2156_v25 = vpop.f32.mrf.mxu0  ;;  %v2164_v27 = vpop.f32.mrf.mxu1 }
 0x5be   :  { %v1531_v18 = vpop.f32.mrf.mxu0  ;;  %v1607_v26 = vpop.f32.mrf.mxu1 }
 0x5bf   :  { %v1537_v30 = vadd.f32 %v1531_v18, %v1457_v29  ;;  %v1970_v18 = vld [vmem:[%s2950_s14] ss:$0 sm:$0xff]  ;;  %s2509_s14 = smov [#allocation17]  }
 0x5c0   :  { %v2171_v31 = vpop.f32.mrf.mxu0  ;;  %v2179_v32 = vpop.f32.mrf.mxu1  ;;  %s1908_s5 = sshll.u32 %s2509_s14, 4  ;;  %s1909_s5 = int_to_ptr.vmem [resolvable:$true] %s1908_s5 }
 0x5c1   :  { %v1613_v33 = vadd.f32 %v1607_v26, %v1537_v30  ;;  %v1971_v30 = vld [vmem:[%s2951_s15] ss:$0 sm:$0xff]  ;;  %s2463_s15 = scalar_lea.vmem %s1909_s5, 128  ;;  %p2468_p4 = scmp.lt.s32.totalorder %s1909_s5, %s1909_s5 }
 0x5c2   :  { %v1534_v34 = vpop.f32.mrf.mxu0  ;;  %v1610_v35 = vpop.f32.mrf.mxu1  ;;  %p2464_p3 = scmp.ne.s32.totalorder %s1909_s5, %s2463_s15  ;;  %p2469_p5 = scmp.lt.s32.totalorder %s2463_s15, %s2463_s15 }
 0x5c3   :  { %v1621_v36 = vadd.f32 %v1957_v28, %v1613_v33 }
 0x5c4   :  { %v2172_v37 = vpop.f32.mrf.mxu0  ;;  %v2180_v38 = vpop.f32.mrf.mxu1  ;;  %p2470_p6 = por %p2469_p5, %p2468_p4 }
 0x5c5   :  { %v1622_v40 = vadd.f32 %v2282_v39, %v1621_v36 }
 0x5c6   :  { %p2471_p7 = pnand %p2470_p6, %p2464_p3 }
 0x5c7   :  { %v1625_v41 = vsel %vm203_vm1, %v1622_v40, 0.0 }
 0x5c8   :  { %1626 = vadd.xlane.f32.xlu0 %v1625_v41 }
 0x651   :  { %v1627_v42 = vpop.xlane.xlu0 %1626 }
 0x652   :  { %v1629_v43 = vmul.f32 0.03125, %v1627_v42 }
 0x654   :  { %v1630_v44 = vsub.f32 %v1622_v40, %v1629_v43 }
 0x656   :  { %v1631_v45 = vmul.f32 %v1630_v44, %v1630_v44 }
 0x658   :  { %v1632_v46 = vsel %vm203_vm1, %v1631_v45, 0.0 }
 0x659   :  { %1633 = vadd.xlane.f32.xlu1 %v1632_v46 }
 0x6e2   :  { %v1634_v51 = vpop.xlane.xlu1 %1633 }
 0x6e3   :  { %v1635_v52 = vmul.f32 0.03125, %v1634_v51 }
 0x6e5   :  { %v1636_v53 = vadd.f32 1e-05, %v1635_v52 }
 0x6e7   :  { %2276 = vrsqrt.f32 %v1636_v53 }
 0x6f4   :  { %v2277_v54 = vpop.eup %2276 }
 0x6f5   :  { %v1638_v58 = vmul.f32 %v2277_v54, %v1630_v44 }
 0x6f7   :  { %v1645_v56 = vmul.f32 %v1958_v7, %v1638_v58 }
 0x6f9   :  { %v1652_v57 = vadd.f32 %v1959_v55, %v1645_v56 }
 0x6fb   :  { %v1653_v59 = vpack.c.bf16 %v1652_v57, %v1652_v57 }
 0x6fd   :  { %2186 = vmatmul.mubr.msk.bf16.vlgmr.msra.gmra.mxu0 %vm203_vm1, %v1653_v59 }
 0x6fe   :  { %2205 = vmatprep.mubr.msk.bf16.mxu0 %vm2507_vm0, %v2506_v0  ;;  %2202 = vmatpush3.bf16.msra.mxu0 %v2242_v23 }
 0x6ff   :  { %2203 = vmatprep.subr.bf16.mxu0 %v2506_v0 }
 0x702   :  { %2204 = vmatpush3.bf16.msra.mxu0 %v2243_v24 }
 0x7bd   :  { %v1714_v2 = vpop.f32.mrf.mxu0 }
 0x7be   :  { %v1715_v4 = vadd.f32 %v1960_v1, %v1714_v2 }
 0x7bf   :  { %v2187_v5 = vpop.f32.mrf.mxu0 }
 0x7c0   :  { %v1720_v61 = vmax.f32 %v1715_v4, 0.0 }
 0x7c1   :  { %v1717_v6 = vpop.f32.mrf.mxu0 }
 0x7c2   :  { %v1721_v8 = vpack.c.bf16 %v1720_v61, %v1720_v61 }
 0x7c3   :  { %v2188_v10 = vpop.f32.mrf.mxu0 }
 0x7c4   :  { %2198 = vmatmul.mubr.msk.bf16.vlgmr.msra.gmra.mxu1 %vm1761_vm12, %v1721_v8 }
 0x884   :  { %v1799_v63 = vpop.f32.mrf.mxu1 }
 0x885   :  { %v1800_v13 = vadd.f32 %v1964_v12, %v1799_v63 }
 0x886   :  { %v2199_v14 = vpop.f32.mrf.mxu1 }
 0x887   :  { %v1805_v3 = vadd.f32 %v1800_v13, %v1652_v57 }
 0x888   :  { %v1802_v15 = vpop.f32.mrf.mxu1 }
 0x889   :  { %v1808_v17 = vsel %vm203_vm1, %v1805_v3, 0.0 }
 0x88a   :  { %1809 = vadd.xlane.f32.xlu0 %v1808_v17  ;;  %v2200_v9 = vpop.f32.mrf.mxu1 }
 0x913   :  { %v1810_v19 = vpop.xlane.xlu0 %1809 }
 0x914   :  { %v1811_v20 = vmul.f32 0.03125, %v1810_v19 }
 0x916   :  { %v1812_v21 = vsub.f32 %v1805_v3, %v1811_v20 }
 0x918   :  { %v1813_v11 = vmul.f32 %v1812_v21, %v1812_v21 }
 0x91a   :  { %v1814_v22 = vsel %vm203_vm1, %v1813_v11, 0.0 }
 0x91b   :  { %1815 = vadd.xlane.f32.xlu1 %v1814_v22 }
 0x9a4   :  { %v1816_v16 = vpop.xlane.xlu1 %1815 }
 0x9a5   :  { %v1817_v25 = vmul.f32 0.03125, %v1816_v16 }
 0x9a7   :  { %v1818_v27 = vadd.f32 1e-05, %v1817_v25 }
 0x9a9   :  { %2278 = vrsqrt.f32 %v1818_v27 }
 0x9b6   :  { %v2279_v29 = vpop.eup %2278 }
 0x9b7   :  { %v1820_v26 = vmul.f32 %v2279_v29, %v1812_v21 }
 0x9b9   :  { %v1827_v28 = vmul.f32 %v1970_v18, %v1820_v26 }
 0x9bb   :  { %v1834_v31 = vadd.f32 %v1971_v30, %v1827_v28 }
 0x9bd   :  { %v1835_v32 = vpack.c.bf16 %v1834_v31, %v1834_v31 }
 0x9bf   :  { %2206 = vmatmul.mubr.msk.bf16.vlgmr.msra.gmra.mxu0 %vm203_vm1, %v1835_v32 }
 0xa7f   :  { %v1889_v0 = vpop.f32.mrf.mxu0 }
 0xa80   :  { %v1895_v33 = vmul.f32 %v1889_v0, %v1889_v0 }
 0xa81   :  { %v2207_v34 = vpop.f32.mrf.mxu0 }
 0xa82   :  { %1896 = vadd.xlane.f32.xlu0 %v1895_v33 }
 0xa83   :  { %v1892_v35 = vpop.f32.mrf.mxu0 }
 0xa85   :  { %v2208_v36 = vpop.f32.mrf.mxu0 }
 0xb0b   :  { %v1897_v37 = vpop.xlane.xlu0 %1896 }
 0xb0c   :  { %v1898_v38 = vadd.f32 1e-12, %v1897_v37 }
 0xb0e   :  { %2280 = vrsqrt.f32 %v1898_v38 }
 0xb1b   :  { %v2281_v39 = vpop.eup %2280 }
 0xb1c   :  { %v1900_v40 = vmul.f32 %v2281_v39, %v1889_v0 }
 0xb1e   :  { %1901 = vst [vmem:[#allocation17] sm:$0xff] %v1900_v40 }
 0xb1f   :  { %2474 = shalt.err (!%p2471_p7)
}
 0xb20   :  { %1911 = dma.vmem_to_hbm [thread:$0]  %s1909_s5, 128, %s2953_s17, [#allocation4]  }
 0xb21   :  { %2493 = dma.done.wait [#allocation4], 128  }
 0xb22   :  { %2494 = vsyncadd [#allocation4], 4294967168 }
 0xb23   :  { %1915 = vsyncpa [#allocation3], 1 }
 0xb24   :  { %1916 = vsyncpa [#allocation6], 1 }
 0xb25   :  { %1917 = vsyncpa [#allocation9], 1 }
 0xb26   :  { %1918 = vsyncpa [#allocation12], 1 }
 0xb27   :  { %1919 = vsyncpa [#allocation15], 1 }
 0xb28   :  { %1920 = vsyncpa [#allocation4], 1 }

</bundles_post_ra>
